<compile_context>
chip_gen: v7x
topology: tpu7x:2x2x1
jax: 0.10.0
libtpu: 0.0.40
codegen_flags: <defaults>
</compile_context>

<pallas_src>
import math

import jax
import jax.numpy as jnp
import numpy as np
from jax.experimental import pallas as pl
from jax.experimental.pallas import tpu as pltpu


# -----------------------------------------------------------------------------
# Kernel (one grid step == one batch slab of Bc elements; Bc = B // core_splits)
# -----------------------------------------------------------------------------
def make_attention_rnn_kernel(n_heads, head_dim, n_layers, hidden_size, seq_len,
                              batch_per_step):
    emb = n_heads * head_dim
    H = hidden_size
    S = seq_len
    Bc = batch_per_step

    def kernel(x_ref, wqkv_ref, bqkv_ref, wo_ref, bo_ref,
               wih0_ref, whh0_ref, b0_ref, *rest):
        n_extra = 3 * (n_layers - 1)          # per layer >=1: wih, whh, folded bias
        layer_refs = rest[:n_extra]
        wf_ref = rest[n_extra]
        bf_ref = rest[n_extra + 1]
        out_ref = rest[n_extra + 2]

        x = x_ref[...].reshape(Bc * S, emb)    # whole batch slab at once

        # ---------------- Multi-head self-attention ----------------
        # Fused QKV: one (Bc*S, E) @ (E, 3E) matmul.
        qkv = jnp.dot(x, wqkv_ref[...],
                      preferred_element_type=jnp.float32) + bqkv_ref[...]
        # Flatten (batch, heads) into a single batch dim for the einsums.
        q = (qkv[:, :emb].reshape(Bc, S, n_heads, head_dim)
             .transpose(0, 2, 1, 3).reshape(Bc * n_heads, S, head_dim))
        k = (qkv[:, emb:2 * emb].reshape(Bc, S, n_heads, head_dim)
             .transpose(0, 2, 1, 3).reshape(Bc * n_heads, S, head_dim))
        v = (qkv[:, 2 * emb:].reshape(Bc, S, n_heads, head_dim)
             .transpose(0, 2, 1, 3).reshape(Bc * n_heads, S, head_dim))

        scale = 1.0 / math.sqrt(head_dim)
        scores = jnp.einsum("zqd,zkd->zqk", q, k,
                            preferred_element_type=jnp.float32) * scale
        scores = scores - jnp.max(scores, axis=-1, keepdims=True)
        p = jnp.exp(scores)
        # Softmax divide on the EUP (approx reciprocal); VALU slots stay free.
        attn = p * pl.reciprocal(jnp.sum(p, axis=-1, keepdims=True), approx=True)
        # TODO(synk): dropout(attention) is identity at inference; no RNG applied.
        ctx = jnp.einsum("zqk,zkd->zqd", attn, v,
                         preferred_element_type=jnp.float32)
        ctx = (ctx.reshape(Bc, n_heads, S, head_dim)
               .transpose(0, 2, 1, 3).reshape(Bc * S, emb))
        attn_out = jnp.dot(ctx, wo_ref[...],
                           preferred_element_type=jnp.float32) + bo_ref[...]   # (Bc*S, E)

        # ---------------- Stacked RNN over time (sequential over S) ----------------
        # One time-major relayout outside the serial chain so each timestep is a
        # leading-axis slice.
        ao_tm = attn_out.reshape(Bc, S, emb).transpose(1, 0, 2).reshape(S * Bc, emb)
        # Layer-0 input projection hoisted out of the time loop (bih0+bhh0 folded).
        pre0 = (jnp.dot(ao_tm, wih0_ref[...], preferred_element_type=jnp.float32)
                + b0_ref[...]).reshape(S, Bc, H)

        # Hoist all weight loads out of the unrolled time loop.
        whh0 = whh0_ref[...]
        wih = [layer_refs[3 * i][...] for i in range(n_layers - 1)]
        whh = [layer_refs[3 * i + 1][...] for i in range(n_layers - 1)]
        bias = [layer_refs[3 * i + 2][...] for i in range(n_layers - 1)]

        hs = [jnp.zeros((Bc, H), jnp.float32) for _ in range(n_layers)]
        x_t = hs[-1]
        # Small fixed S: static unroll.
        # TODO(synk): for larger S switch to lax.fori_loop(unroll=2-4) carrying the
        # (Bc, H) states and pl.ds-indexing pre0, to bound vreg live ranges.
        for t in range(S):
            h0 = jnp.tanh(pre0[t] + jnp.dot(hs[0], whh0,
                                            preferred_element_type=jnp.float32))
            hs[0] = h0
            x_t = h0
            for i in range(1, n_layers):
                # Two dots, no concat on the serial chain.
                hi = jnp.tanh(jnp.dot(x_t, wih[i - 1],
                                      preferred_element_type=jnp.float32)
                              + jnp.dot(hs[i], whh[i - 1],
                                        preferred_element_type=jnp.float32)
                              + bias[i - 1])
                hs[i] = hi
                x_t = hi

        # dropout on the last hidden state is identity at inference
        out = jnp.dot(x_t, wf_ref[...],
                      preferred_element_type=jnp.float32) + bf_ref[...]     # (Bc, O)
        out_ref[...] = out.astype(out_ref.dtype)                            # lane-dense store

    return kernel


# -----------------------------------------------------------------------------
# Wrapper
# -----------------------------------------------------------------------------
def _const_spec(arr):
    nd = arr.ndim
    return pl.BlockSpec(arr.shape, lambda g, nd=nd: (0,) * nd)


def attention_rnn_forward(x, params, *, n_heads, n_layers, hidden_size, output_size,
                          core_splits=1):
    """core_splits=1 on v5e/v6e (single TC); set 2 on v7x to shard B over both TCs."""
    B, S, E = x.shape
    assert E % n_heads == 0, "emb_dim must be divisible by n_heads"
    assert B % core_splits == 0
    head_dim = E // n_heads
    Bc = B // core_splits

    # ---- host-side weight packing (layout-only work, outside the kernel) ----
    w_qkv = jnp.concatenate([params["wq"], params["wk"], params["wv"]], axis=1)  # (E, 3E)
    b_qkv = jnp.concatenate([params["bq"], params["bk"], params["bv"]], axis=1)  # (1, 3E)
    b0 = params["bih0"] + params["bhh0"]                                         # (1, H)
    layer_inputs = []
    for i in range(1, n_layers):
        layer_inputs += [params[f"wih{i}"], params[f"whh{i}"],
                         params[f"bih{i}"] + params[f"bhh{i}"]]

    inputs = ([x, w_qkv, b_qkv, params["wo"], params["bo"],
               params["wih0"], params["whh0"], b0]
              + layer_inputs + [params["wf"], params["bf"]])

    kernel = make_attention_rnn_kernel(n_heads, head_dim, n_layers, hidden_size, S, Bc)

    in_specs = [pl.BlockSpec((Bc, S, E), lambda g: (g, 0, 0))]
    in_specs += [_const_spec(a) for a in inputs[1:]]
    out_specs = pl.BlockSpec((Bc, output_size), lambda g: (g, 0))
    # TODO(synk): when E/S/H grow, set pipeline_mode=pl.Buffered(1) on the constant
    # weight specs and pass an explicit vmem_limit_bytes (v7x has 64 MiB VMEM).

    # Advisory cost estimate (kernel is overhead/latency bound at these shapes).
    H = hidden_size
    flops = B * (2 * S * E * 3 * E            # fused QKV
                 + 2 * S * S * E              # scores (all heads)
                 + 2 * S * S * E              # attn @ V
                 + 2 * S * E * E              # output projection
                 + 2 * S * E * H              # hoisted layer-0 input projection
                 + S * (2 * H * H + (n_layers - 1) * 2 * 2 * H * H)
                 + 2 * H * output_size)
    transcendentals = B * (n_heads * S * S + n_heads * S + S * n_layers * H)
    bytes_accessed = sum(int(a.size) * a.dtype.itemsize for a in inputs) \
        + B * output_size * 4

    res = pl.pallas_call(
        kernel,
        grid=(core_splits,),
        out_shape=jax.ShapeDtypeStruct((B, output_size), jnp.float32),
        in_specs=in_specs,
        out_specs=out_specs,
        compiler_params=pltpu.CompilerParams(
            dimension_semantics=("parallel",)),
        cost_estimate=pl.CostEstimate(
            flops=int(flops),
            transcendentals=int(transcendentals),
            bytes_accessed=int(bytes_accessed)),
    )(*inputs)
    return res                                  # (B, output_size)


# -----------------------------------------------------------------------------
# Deterministic parameter init (PyTorch Linear default: U(-1/sqrt(fan_in), +))
# -----------------------------------------------------------------------------
def init_linear(key, in_f, out_f):
    kw, kb = jax.random.split(key)
    bound = 1.0 / math.sqrt(in_f)
    w = jax.random.uniform(kw, (in_f, out_f), jnp.float32, -bound, bound)   # (in, out)
    b = jax.random.uniform(kb, (1, out_f), jnp.float32, -bound, bound)
    return w, b


def init_params(key, input_size, emb_dim, hidden_size, n_layers, output_size):
    keys = jax.random.split(key, 6 + 2 * n_layers)
    p = {}
    p["wq"], p["bq"] = init_linear(keys[0], emb_dim, emb_dim)
    p["wk"], p["bk"] = init_linear(keys[1], emb_dim, emb_dim)
    p["wv"], p["bv"] = init_linear(keys[2], emb_dim, emb_dim)
    p["wo"], p["bo"] = init_linear(keys[3], emb_dim, emb_dim)
    for i in range(n_layers):
        in_f = input_size if i == 0 else hidden_size
        p[f"wih{i}"], p[f"bih{i}"] = init_linear(keys[4 + 2 * i], in_f, hidden_size)
        p[f"whh{i}"], p[f"bhh{i}"] = init_linear(keys[5 + 2 * i], hidden_size, hidden_size)
    p["wf"], p["bf"] = init_linear(keys[4 + 2 * n_layers], hidden_size, output_size)
    return p


# -----------------------------------------------------------------------------
# Pure-JAX reference (same math as the PyTorch module) for correctness check
# -----------------------------------------------------------------------------
def reference_forward(x, params, *, n_heads, n_layers, hidden_size, output_size):
    B, S, E = x.shape
    hd = E // n_heads
    q = x @ params["wq"] + params["bq"]
    k = x @ params["wk"] + params["bk"]
    v = x @ params["wv"] + params["bv"]
    q = q.reshape(B, S, n_heads, hd).transpose(0, 2, 1, 3)
    k = k.reshape(B, S, n_heads, hd).transpose(0, 2, 1, 3)
    v = v.reshape(B, S, n_heads, hd).transpose(0, 2, 1, 3)
    scores = jnp.einsum("bhqd,bhkd->bhqk", q, k) / math.sqrt(hd)
    attn = jax.nn.softmax(scores, axis=-1)
    ao = jnp.einsum("bhqk,bhkd->bhqd", attn, v).transpose(0, 2, 1, 3).reshape(B, S, E)
    ao = ao @ params["wo"] + params["bo"]

    hs = [jnp.zeros((B, hidden_size), jnp.float32) for _ in range(n_layers)]
    x_t = ao[:, 0, :]
    for t in range(S):
        x_t = ao[:, t, :]
        for i in range(n_layers):
            pre = (x_t @ params[f"wih{i}"] + params[f"bih{i}"]
                   + hs[i] @ params[f"whh{i}"] + params[f"bhh{i}"])
            hs[i] = jnp.tanh(pre)
            x_t = hs[i]
    return x_t @ params["wf"] + params["bf"]


# -----------------------------------------------------------------------------
if __name__ == "__main__":
    B, S = 2, 8
    emb_dim = 32
    input_size = emb_dim          # RNN layer 0 consumes the attention output
    n_heads = 4
    hidden_size = 32
    n_layers = 2
    output_size = 8
    dropout = 0.0                 # inference: identity

    key = jax.random.PRNGKey(0)
    kx, kp = jax.random.split(key)
    x = jax.random.normal(kx, (B, S, emb_dim), jnp.float32)
    params = init_params(kp, input_size, emb_dim, hidden_size, n_layers, output_size)

    out = attention_rnn_forward(
        x, params,
        n_heads=n_heads, n_layers=n_layers,
        hidden_size=hidden_size, output_size=output_size,
        core_splits=1,            # set 2 on v7x (2 TensorCores) when B is divisible
    )
    out = jax.block_until_ready(out)

    ref = reference_forward(
        x, params,
        n_heads=n_heads, n_layers=n_layers,
        hidden_size=hidden_size, output_size=output_size,
    )
    # Tolerance loosened slightly vs. exact divide because the kernel uses the
    # EUP approximate reciprocal for the softmax denominator.
    np.testing.assert_allclose(np.asarray(out), np.asarray(ref), rtol=2e-3, atol=2e-3)

    print("KERNEL_OK")
</pallas_src>

<mosaic_0001>
module attributes {stable_mosaic.version = 11 : i64} {
  func.func @kernel(%arg0: i32, %arg1: memref<2x8x32xf32, #tpu.memory_space<vmem>>, %arg2: memref<32x96xf32, #tpu.memory_space<vmem>>, %arg3: memref<1x96xf32, #tpu.memory_space<vmem>>, %arg4: memref<32x32xf32, #tpu.memory_space<vmem>>, %arg5: memref<1x32xf32, #tpu.memory_space<vmem>>, %arg6: memref<32x32xf32, #tpu.memory_space<vmem>>, %arg7: memref<32x32xf32, #tpu.memory_space<vmem>>, %arg8: memref<1x32xf32, #tpu.memory_space<vmem>>, %arg9: memref<32x32xf32, #tpu.memory_space<vmem>>, %arg10: memref<32x32xf32, #tpu.memory_space<vmem>>, %arg11: memref<1x32xf32, #tpu.memory_space<vmem>>, %arg12: memref<32x8xf32, #tpu.memory_space<vmem>>, %arg13: memref<1x8xf32, #tpu.memory_space<vmem>>, %arg14: memref<2x8xf32, #tpu.memory_space<vmem>>) attributes {dimension_semantics = [#tpu.dimension_semantics<parallel>], iteration_bounds = array<i64: 1>, scalar_prefetch = 0 : i64, scratch_operands = 0 : i64, tpu.core_type = #tpu.core_type<tc>, window_params = [{transform_indices = @transform_0, window_bounds = array<i64: 2, 8, 32>}, {pipeline_mode = #tpu.pipeline_mode<synchronous>, transform_indices = @transform_1, window_bounds = array<i64: 32, 96>}, {pipeline_mode = #tpu.pipeline_mode<synchronous>, transform_indices = @transform_2, window_bounds = array<i64: 1, 96>}, {pipeline_mode = #tpu.pipeline_mode<synchronous>, transform_indices = @transform_3, window_bounds = array<i64: 32, 32>}, {pipeline_mode = #tpu.pipeline_mode<synchronous>, transform_indices = @transform_4, window_bounds = array<i64: 1, 32>}, {pipeline_mode = #tpu.pipeline_mode<synchronous>, transform_indices = @transform_5, window_bounds = array<i64: 32, 32>}, {pipeline_mode = #tpu.pipeline_mode<synchronous>, transform_indices = @transform_6, window_bounds = array<i64: 32, 32>}, {pipeline_mode = #tpu.pipeline_mode<synchronous>, transform_indices = @transform_7, window_bounds = array<i64: 1, 32>}, {pipeline_mode = #tpu.pipeline_mode<synchronous>, transform_indices = @transform_8, window_bounds = array<i64: 32, 32>}, {pipeline_mode = #tpu.pipeline_mode<synchronous>, transform_indices = @transform_9, window_bounds = array<i64: 32, 32>}, {pipeline_mode = #tpu.pipeline_mode<synchronous>, transform_indices = @transform_10, window_bounds = array<i64: 1, 32>}, {pipeline_mode = #tpu.pipeline_mode<synchronous>, transform_indices = @transform_11, window_bounds = array<i64: 32, 8>}, {pipeline_mode = #tpu.pipeline_mode<synchronous>, transform_indices = @transform_12, window_bounds = array<i64: 1, 8>}, {transform_indices = @transform_13, window_bounds = array<i64: 2, 8>}]} {
    %c0 = arith.constant 0 : index
    %c0_0 = arith.constant 0 : index
    %c0_1 = arith.constant 0 : index
    %0 = vector.load %arg1[%c0, %c0_0, %c0_1] : memref<2x8x32xf32, #tpu.memory_space<vmem>>, vector<2x8x32xf32>
    %1 = vector.shape_cast %0 : vector<2x8x32xf32> to vector<16x32xf32>
    %c0_2 = arith.constant 0 : index
    %c0_3 = arith.constant 0 : index
    %2 = vector.load %arg2[%c0_2, %c0_3] : memref<32x96xf32, #tpu.memory_space<vmem>>, vector<32x96xf32>
    %cst = arith.constant dense<0.000000e+00> : vector<16x96xf32>
    %3 = tpu.matmul %1, %2, %cst {dimension_numbers = #tpu.dot_dimension_numbers<[1], [0], [0], [1], [0, 0, 1, 1], [], []>} : vector<16x32xf32>, vector<32x96xf32>, vector<16x96xf32> -> vector<16x96xf32>
    %c0_4 = arith.constant 0 : index
    %c0_5 = arith.constant 0 : index
    %4 = vector.load %arg3[%c0_4, %c0_5] : memref<1x96xf32, #tpu.memory_space<vmem>>, vector<1x96xf32>
    %5 = vector.broadcast %4 : vector<1x96xf32> to vector<16x96xf32>
    %6 = arith.addf %3, %5 : vector<16x96xf32>
    %7 = vector.extract_strided_slice %6 {offsets = [0, 0], sizes = [16, 32], strides = [1, 1]} : vector<16x96xf32> to vector<16x32xf32>
    %8 = vector.shape_cast %7 : vector<16x32xf32> to vector<2x8x4x8xf32>
    %9 = tpu.transpose %8, [0, 2, 1, 3] : vector<2x8x4x8xf32> -> vector<2x4x8x8xf32>
    %10 = vector.shape_cast %9 : vector<2x4x8x8xf32> to vector<8x8x8xf32>
    %11 = vector.extract_strided_slice %6 {offsets = [0, 32], sizes = [16, 32], strides = [1, 1]} : vector<16x96xf32> to vector<16x32xf32>
    %12 = vector.shape_cast %11 : vector<16x32xf32> to vector<2x8x4x8xf32>
    %13 = tpu.transpose %12, [0, 2, 1, 3] : vector<2x8x4x8xf32> -> vector<2x4x8x8xf32>
    %14 = vector.shape_cast %13 : vector<2x4x8x8xf32> to vector<8x8x8xf32>
    %15 = vector.extract_strided_slice %6 {offsets = [0, 64], sizes = [16, 32], strides = [1, 1]} : vector<16x96xf32> to vector<16x32xf32>
    %16 = vector.shape_cast %15 : vector<16x32xf32> to vector<2x8x4x8xf32>
    %17 = tpu.transpose %16, [0, 2, 1, 3] : vector<2x8x4x8xf32> -> vector<2x4x8x8xf32>
    %18 = vector.shape_cast %17 : vector<2x4x8x8xf32> to vector<8x8x8xf32>
    "tpu.trace_start"() <{level = 10 : i32, message = "zqd,zkd->zqk"}> : () -> ()
    %cst_6 = arith.constant dense<0.000000e+00> : vector<8x8x8xf32>
    %19 = tpu.matmul %10, %14, %cst_6 {dimension_numbers = #tpu.dot_dimension_numbers<[2], [2], [1], [1], [0, 0, 0, 1, 1, 1], [0], [0]>} : vector<8x8x8xf32>, vector<8x8x8xf32>, vector<8x8x8xf32> -> vector<8x8x8xf32>
    "tpu.trace_stop"() : () -> ()
    %cst_7 = arith.constant 0.353553385 : f32
    %20 = vector.broadcast %cst_7 : f32 to vector<8x8x8xf32>
    %21 = arith.mulf %19, %20 : vector<8x8x8xf32>
    %cst_8 = arith.constant dense<0xFF800000> : vector<8x8xf32>
    %22 = vector.multi_reduction <maximumf>, %21, %cst_8 [2] : vector<8x8x8xf32> to vector<8x8xf32>
    %23 = vector.shape_cast %22 : vector<8x8xf32> to vector<8x8x1xf32>
    %24 = vector.broadcast %23 : vector<8x8x1xf32> to vector<8x8x8xf32>
    %25 = arith.subf %21, %24 : vector<8x8x8xf32>
    %26 = math.exp %25 : vector<8x8x8xf32>
    %cst_9 = arith.constant dense<0.000000e+00> : vector<8x8xf32>
    %27 = vector.multi_reduction <add>, %26, %cst_9 [2] : vector<8x8x8xf32> to vector<8x8xf32>
    %28 = vector.shape_cast %27 : vector<8x8xf32> to vector<8x8x1xf32>
    %29 = tpu.reciprocal %28 {approx = true} : vector<8x8x1xf32> -> vector<8x8x1xf32>
    %30 = vector.broadcast %29 : vector<8x8x1xf32> to vector<8x8x8xf32>
    %31 = arith.mulf %26, %30 : vector<8x8x8xf32>
    "tpu.trace_start"() <{level = 10 : i32, message = "zqk,zkd->zqd"}> : () -> ()
    %cst_10 = arith.constant dense<0.000000e+00> : vector<8x8x8xf32>
    %32 = tpu.matmul %31, %18, %cst_10 {dimension_numbers = #tpu.dot_dimension_numbers<[2], [1], [1], [2], [0, 0, 0, 1, 1, 2], [0], [0]>} : vector<8x8x8xf32>, vector<8x8x8xf32>, vector<8x8x8xf32> -> vector<8x8x8xf32>
    "tpu.trace_stop"() : () -> ()
    %33 = vector.shape_cast %32 : vector<8x8x8xf32> to vector<2x4x8x8xf32>
    %34 = tpu.transpose %33, [0, 2, 1, 3] : vector<2x4x8x8xf32> -> vector<2x8x4x8xf32>
    %35 = vector.shape_cast %34 : vector<2x8x4x8xf32> to vector<16x32xf32>
    %c0_11 = arith.constant 0 : index
    %c0_12 = arith.constant 0 : index
    %36 = vector.load %arg4[%c0_11, %c0_12] : memref<32x32xf32, #tpu.memory_space<vmem>>, vector<32x32xf32>
    %cst_13 = arith.constant dense<0.000000e+00> : vector<16x32xf32>
    %37 = tpu.matmul %35, %36, %cst_13 {dimension_numbers = #tpu.dot_dimension_numbers<[1], [0], [0], [1], [0, 0, 1, 1], [], []>} : vector<16x32xf32>, vector<32x32xf32>, vector<16x32xf32> -> vector<16x32xf32>
    %c0_14 = arith.constant 0 : index
    %c0_15 = arith.constant 0 : index
    %38 = vector.load %arg5[%c0_14, %c0_15] : memref<1x32xf32, #tpu.memory_space<vmem>>, vector<1x32xf32>
    %39 = vector.broadcast %38 : vector<1x32xf32> to vector<16x32xf32>
    %40 = arith.addf %37, %39 : vector<16x32xf32>
    %41 = vector.shape_cast %40 : vector<16x32xf32> to vector<2x8x32xf32>
    %42 = tpu.transpose %41, [1, 0, 2] : vector<2x8x32xf32> -> vector<8x2x32xf32>
    %43 = vector.shape_cast %42 : vector<8x2x32xf32> to vector<16x32xf32>
    %c0_16 = arith.constant 0 : index
    %c0_17 = arith.constant 0 : index
    %44 = vector.load %arg6[%c0_16, %c0_17] : memref<32x32xf32, #tpu.memory_space<vmem>>, vector<32x32xf32>
    %cst_18 = arith.constant dense<0.000000e+00> : vector<16x32xf32>
    %45 = tpu.matmul %43, %44, %cst_18 {dimension_numbers = #tpu.dot_dimension_numbers<[1], [0], [0], [1], [0, 0, 1, 1], [], []>} : vector<16x32xf32>, vector<32x32xf32>, vector<16x32xf32> -> vector<16x32xf32>
    %c0_19 = arith.constant 0 : index
    %c0_20 = arith.constant 0 : index
    %46 = vector.load %arg8[%c0_19, %c0_20] : memref<1x32xf32, #tpu.memory_space<vmem>>, vector<1x32xf32>
    %47 = vector.broadcast %46 : vector<1x32xf32> to vector<16x32xf32>
    %48 = arith.addf %45, %47 : vector<16x32xf32>
    %49 = vector.shape_cast %48 : vector<16x32xf32> to vector<8x2x32xf32>
    %c0_21 = arith.constant 0 : index
    %c0_22 = arith.constant 0 : index
    %50 = vector.load %arg7[%c0_21, %c0_22] : memref<32x32xf32, #tpu.memory_space<vmem>>, vector<32x32xf32>
    %c0_23 = arith.constant 0 : index
    %c0_24 = arith.constant 0 : index
    %51 = vector.load %arg9[%c0_23, %c0_24] : memref<32x32xf32, #tpu.memory_space<vmem>>, vector<32x32xf32>
    %c0_25 = arith.constant 0 : index
    %c0_26 = arith.constant 0 : index
    %52 = vector.load %arg10[%c0_25, %c0_26] : memref<32x32xf32, #tpu.memory_space<vmem>>, vector<32x32xf32>
    %c0_27 = arith.constant 0 : index
    %c0_28 = arith.constant 0 : index
    %53 = vector.load %arg11[%c0_27, %c0_28] : memref<1x32xf32, #tpu.memory_space<vmem>>, vector<1x32xf32>
    %cst_29 = arith.constant 0.000000e+00 : f32
    %54 = vector.broadcast %cst_29 : f32 to vector<2x32xf32>
    %cst_30 = arith.constant 0.000000e+00 : f32
    %55 = vector.broadcast %cst_30 : f32 to vector<2x32xf32>
    %56 = vector.extract_strided_slice %49 {offsets = [0, 0, 0], sizes = [1, 2, 32], strides = [1, 1, 1]} : vector<8x2x32xf32> to vector<1x2x32xf32>
    %57 = vector.shape_cast %56 : vector<1x2x32xf32> to vector<2x32xf32>
    %cst_31 = arith.constant dense<0.000000e+00> : vector<2x32xf32>
    %58 = tpu.matmul %54, %50, %cst_31 {dimension_numbers = #tpu.dot_dimension_numbers<[1], [0], [0], [1], [0, 0, 1, 1], [], []>} : vector<2x32xf32>, vector<32x32xf32>, vector<2x32xf32> -> vector<2x32xf32>
    %59 = arith.addf %57, %58 : vector<2x32xf32>
    %60 = math.tanh %59 : vector<2x32xf32>
    %cst_32 = arith.constant dense<0.000000e+00> : vector<2x32xf32>
    %61 = tpu.matmul %60, %51, %cst_32 {dimension_numbers = #tpu.dot_dimension_numbers<[1], [0], [0], [1], [0, 0, 1, 1], [], []>} : vector<2x32xf32>, vector<32x32xf32>, vector<2x32xf32> -> vector<2x32xf32>
    %cst_33 = arith.constant dense<0.000000e+00> : vector<2x32xf32>
    %62 = tpu.matmul %55, %52, %cst_33 {dimension_numbers = #tpu.dot_dimension_numbers<[1], [0], [0], [1], [0, 0, 1, 1], [], []>} : vector<2x32xf32>, vector<32x32xf32>, vector<2x32xf32> -> vector<2x32xf32>
    %63 = arith.addf %61, %62 : vector<2x32xf32>
    %64 = vector.broadcast %53 : vector<1x32xf32> to vector<2x32xf32>
    %65 = arith.addf %63, %64 : vector<2x32xf32>
    %66 = math.tanh %65 : vector<2x32xf32>
    %67 = vector.extract_strided_slice %49 {offsets = [1, 0, 0], sizes = [1, 2, 32], strides = [1, 1, 1]} : vector<8x2x32xf32> to vector<1x2x32xf32>
    %68 = vector.shape_cast %67 : vector<1x2x32xf32> to vector<2x32xf32>
    %cst_34 = arith.constant dense<0.000000e+00> : vector<2x32xf32>
    %69 = tpu.matmul %60, %50, %cst_34 {dimension_numbers = #tpu.dot_dimension_numbers<[1], [0], [0], [1], [0, 0, 1, 1], [], []>} : vector<2x32xf32>, vector<32x32xf32>, vector<2x32xf32> -> vector<2x32xf32>
    %70 = arith.addf %68, %69 : vector<2x32xf32>
    %71 = math.tanh %70 : vector<2x32xf32>
    %cst_35 = arith.constant dense<0.000000e+00> : vector<2x32xf32>
    %72 = tpu.matmul %71, %51, %cst_35 {dimension_numbers = #tpu.dot_dimension_numbers<[1], [0], [0], [1], [0, 0, 1, 1], [], []>} : vector<2x32xf32>, vector<32x32xf32>, vector<2x32xf32> -> vector<2x32xf32>
    %cst_36 = arith.constant dense<0.000000e+00> : vector<2x32xf32>
    %73 = tpu.matmul %66, %52, %cst_36 {dimension_numbers = #tpu.dot_dimension_numbers<[1], [0], [0], [1], [0, 0, 1, 1], [], []>} : vector<2x32xf32>, vector<32x32xf32>, vector<2x32xf32> -> vector<2x32xf32>
    %74 = arith.addf %72, %73 : vector<2x32xf32>
    %75 = vector.broadcast %53 : vector<1x32xf32> to vector<2x32xf32>
    %76 = arith.addf %74, %75 : vector<2x32xf32>
    %77 = math.tanh %76 : vector<2x32xf32>
    %78 = vector.extract_strided_slice %49 {offsets = [2, 0, 0], sizes = [1, 2, 32], strides = [1, 1, 1]} : vector<8x2x32xf32> to vector<1x2x32xf32>
    %79 = vector.shape_cast %78 : vector<1x2x32xf32> to vector<2x32xf32>
    %cst_37 = arith.constant dense<0.000000e+00> : vector<2x32xf32>
    %80 = tpu.matmul %71, %50, %cst_37 {dimension_numbers = #tpu.dot_dimension_numbers<[1], [0], [0], [1], [0, 0, 1, 1], [], []>} : vector<2x32xf32>, vector<32x32xf32>, vector<2x32xf32> -> vector<2x32xf32>
    %81 = arith.addf %79, %80 : vector<2x32xf32>
    %82 = math.tanh %81 : vector<2x32xf32>
    %cst_38 = arith.constant dense<0.000000e+00> : vector<2x32xf32>
    %83 = tpu.matmul %82, %51, %cst_38 {dimension_numbers = #tpu.dot_dimension_numbers<[1], [0], [0], [1], [0, 0, 1, 1], [], []>} : vector<2x32xf32>, vector<32x32xf32>, vector<2x32xf32> -> vector<2x32xf32>
    %cst_39 = arith.constant dense<0.000000e+00> : vector<2x32xf32>
    %84 = tpu.matmul %77, %52, %cst_39 {dimension_numbers = #tpu.dot_dimension_numbers<[1], [0], [0], [1], [0, 0, 1, 1], [], []>} : vector<2x32xf32>, vector<32x32xf32>, vector<2x32xf32> -> vector<2x32xf32>
    %85 = arith.addf %83, %84 : vector<2x32xf32>
    %86 = vector.broadcast %53 : vector<1x32xf32> to vector<2x32xf32>
    %87 = arith.addf %85, %86 : vector<2x32xf32>
    %88 = math.tanh %87 : vector<2x32xf32>
    %89 = vector.extract_strided_slice %49 {offsets = [3, 0, 0], sizes = [1, 2, 32], strides = [1, 1, 1]} : vector<8x2x32xf32> to vector<1x2x32xf32>
    %90 = vector.shape_cast %89 : vector<1x2x32xf32> to vector<2x32xf32>
    %cst_40 = arith.constant dense<0.000000e+00> : vector<2x32xf32>
    %91 = tpu.matmul %82, %50, %cst_40 {dimension_numbers = #tpu.dot_dimension_numbers<[1], [0], [0], [1], [0, 0, 1, 1], [], []>} : vector<2x32xf32>, vector<32x32xf32>, vector<2x32xf32> -> vector<2x32xf32>
    %92 = arith.addf %90, %91 : vector<2x32xf32>
    %93 = math.tanh %92 : vector<2x32xf32>
    %cst_41 = arith.constant dense<0.000000e+00> : vector<2x32xf32>
    %94 = tpu.matmul %93, %51, %cst_41 {dimension_numbers = #tpu.dot_dimension_numbers<[1], [0], [0], [1], [0, 0, 1, 1], [], []>} : vector<2x32xf32>, vector<32x32xf32>, vector<2x32xf32> -> vector<2x32xf32>
    %cst_42 = arith.constant dense<0.000000e+00> : vector<2x32xf32>
    %95 = tpu.matmul %88, %52, %cst_42 {dimension_numbers = #tpu.dot_dimension_numbers<[1], [0], [0], [1], [0, 0, 1, 1], [], []>} : vector<2x32xf32>, vector<32x32xf32>, vector<2x32xf32> -> vector<2x32xf32>
    %96 = arith.addf %94, %95 : vector<2x32xf32>
    %97 = vector.broadcast %53 : vector<1x32xf32> to vector<2x32xf32>
    %98 = arith.addf %96, %97 : vector<2x32xf32>
    %99 = math.tanh %98 : vector<2x32xf32>
    %100 = vector.extract_strided_slice %49 {offsets = [4, 0, 0], sizes = [1, 2, 32], strides = [1, 1, 1]} : vector<8x2x32xf32> to vector<1x2x32xf32>
    %101 = vector.shape_cast %100 : vector<1x2x32xf32> to vector<2x32xf32>
    %cst_43 = arith.constant dense<0.000000e+00> : vector<2x32xf32>
    %102 = tpu.matmul %93, %50, %cst_43 {dimension_numbers = #tpu.dot_dimension_numbers<[1], [0], [0], [1], [0, 0, 1, 1], [], []>} : vector<2x32xf32>, vector<32x32xf32>, vector<2x32xf32> -> vector<2x32xf32>
    %103 = arith.addf %101, %102 : vector<2x32xf32>
    %104 = math.tanh %103 : vector<2x32xf32>
    %cst_44 = arith.constant dense<0.000000e+00> : vector<2x32xf32>
    %105 = tpu.matmul %104, %51, %cst_44 {dimension_numbers = #tpu.dot_dimension_numbers<[1], [0], [0], [1], [0, 0, 1, 1], [], []>} : vector<2x32xf32>, vector<32x32xf32>, vector<2x32xf32> -> vector<2x32xf32>
    %cst_45 = arith.constant dense<0.000000e+00> : vector<2x32xf32>
    %106 = tpu.matmul %99, %52, %cst_45 {dimension_numbers = #tpu.dot_dimension_numbers<[1], [0], [0], [1], [0, 0, 1, 1], [], []>} : vector<2x32xf32>, vector<32x32xf32>, vector<2x32xf32> -> vector<2x32xf32>
    %107 = arith.addf %105, %106 : vector<2x32xf32>
    %108 = vector.broadcast %53 : vector<1x32xf32> to vector<2x32xf32>
    %109 = arith.addf %107, %108 : vector<2x32xf32>
    %110 = math.tanh %109 : vector<2x32xf32>
    %111 = vector.extract_strided_slice %49 {offsets = [5, 0, 0], sizes = [1, 2, 32], strides = [1, 1, 1]} : vector<8x2x32xf32> to vector<1x2x32xf32>
    %112 = vector.shape_cast %111 : vector<1x2x32xf32> to vector<2x32xf32>
    %cst_46 = arith.constant dense<0.000000e+00> : vector<2x32xf32>
    %113 = tpu.matmul %104, %50, %cst_46 {dimension_numbers = #tpu.dot_dimension_numbers<[1], [0], [0], [1], [0, 0, 1, 1], [], []>} : vector<2x32xf32>, vector<32x32xf32>, vector<2x32xf32> -> vector<2x32xf32>
    %114 = arith.addf %112, %113 : vector<2x32xf32>
    %115 = math.tanh %114 : vector<2x32xf32>
    %cst_47 = arith.constant dense<0.000000e+00> : vector<2x32xf32>
    %116 = tpu.matmul %115, %51, %cst_47 {dimension_numbers = #tpu.dot_dimension_numbers<[1], [0], [0], [1], [0, 0, 1, 1], [], []>} : vector<2x32xf32>, vector<32x32xf32>, vector<2x32xf32> -> vector<2x32xf32>
    %cst_48 = arith.constant dense<0.000000e+00> : vector<2x32xf32>
    %117 = tpu.matmul %110, %52, %cst_48 {dimension_numbers = #tpu.dot_dimension_numbers<[1], [0], [0], [1], [0, 0, 1, 1], [], []>} : vector<2x32xf32>, vector<32x32xf32>, vector<2x32xf32> -> vector<2x32xf32>
    %118 = arith.addf %116, %117 : vector<2x32xf32>
    %119 = vector.broadcast %53 : vector<1x32xf32> to vector<2x32xf32>
    %120 = arith.addf %118, %119 : vector<2x32xf32>
    %121 = math.tanh %120 : vector<2x32xf32>
    %122 = vector.extract_strided_slice %49 {offsets = [6, 0, 0], sizes = [1, 2, 32], strides = [1, 1, 1]} : vector<8x2x32xf32> to vector<1x2x32xf32>
    %123 = vector.shape_cast %122 : vector<1x2x32xf32> to vector<2x32xf32>
    %cst_49 = arith.constant dense<0.000000e+00> : vector<2x32xf32>
    %124 = tpu.matmul %115, %50, %cst_49 {dimension_numbers = #tpu.dot_dimension_numbers<[1], [0], [0], [1], [0, 0, 1, 1], [], []>} : vector<2x32xf32>, vector<32x32xf32>, vector<2x32xf32> -> vector<2x32xf32>
    %125 = arith.addf %123, %124 : vector<2x32xf32>
    %126 = math.tanh %125 : vector<2x32xf32>
    %cst_50 = arith.constant dense<0.000000e+00> : vector<2x32xf32>
    %127 = tpu.matmul %126, %51, %cst_50 {dimension_numbers = #tpu.dot_dimension_numbers<[1], [0], [0], [1], [0, 0, 1, 1], [], []>} : vector<2x32xf32>, vector<32x32xf32>, vector<2x32xf32> -> vector<2x32xf32>
    %cst_51 = arith.constant dense<0.000000e+00> : vector<2x32xf32>
    %128 = tpu.matmul %121, %52, %cst_51 {dimension_numbers = #tpu.dot_dimension_numbers<[1], [0], [0], [1], [0, 0, 1, 1], [], []>} : vector<2x32xf32>, vector<32x32xf32>, vector<2x32xf32> -> vector<2x32xf32>
    %129 = arith.addf %127, %128 : vector<2x32xf32>
    %130 = vector.broadcast %53 : vector<1x32xf32> to vector<2x32xf32>
    %131 = arith.addf %129, %130 : vector<2x32xf32>
    %132 = math.tanh %131 : vector<2x32xf32>
    %133 = vector.extract_strided_slice %49 {offsets = [7, 0, 0], sizes = [1, 2, 32], strides = [1, 1, 1]} : vector<8x2x32xf32> to vector<1x2x32xf32>
    %134 = vector.shape_cast %133 : vector<1x2x32xf32> to vector<2x32xf32>
    %cst_52 = arith.constant dense<0.000000e+00> : vector<2x32xf32>
    %135 = tpu.matmul %126, %50, %cst_52 {dimension_numbers = #tpu.dot_dimension_numbers<[1], [0], [0], [1], [0, 0, 1, 1], [], []>} : vector<2x32xf32>, vector<32x32xf32>, vector<2x32xf32> -> vector<2x32xf32>
    %136 = arith.addf %134, %135 : vector<2x32xf32>
    %137 = math.tanh %136 : vector<2x32xf32>
    %cst_53 = arith.constant dense<0.000000e+00> : vector<2x32xf32>
    %138 = tpu.matmul %137, %51, %cst_53 {dimension_numbers = #tpu.dot_dimension_numbers<[1], [0], [0], [1], [0, 0, 1, 1], [], []>} : vector<2x32xf32>, vector<32x32xf32>, vector<2x32xf32> -> vector<2x32xf32>
    %cst_54 = arith.constant dense<0.000000e+00> : vector<2x32xf32>
    %139 = tpu.matmul %132, %52, %cst_54 {dimension_numbers = #tpu.dot_dimension_numbers<[1], [0], [0], [1], [0, 0, 1, 1], [], []>} : vector<2x32xf32>, vector<32x32xf32>, vector<2x32xf32> -> vector<2x32xf32>
    %140 = arith.addf %138, %139 : vector<2x32xf32>
    %141 = vector.broadcast %53 : vector<1x32xf32> to vector<2x32xf32>
    %142 = arith.addf %140, %141 : vector<2x32xf32>
    %143 = math.tanh %142 : vector<2x32xf32>
    %c0_55 = arith.constant 0 : index
    %c0_56 = arith.constant 0 : index
    %144 = vector.load %arg12[%c0_55, %c0_56] : memref<32x8xf32, #tpu.memory_space<vmem>>, vector<32x8xf32>
    %cst_57 = arith.constant dense<0.000000e+00> : vector<2x8xf32>
    %145 = tpu.matmul %143, %144, %cst_57 {dimension_numbers = #tpu.dot_dimension_numbers<[1], [0], [0], [1], [0, 0, 1, 1], [], []>} : vector<2x32xf32>, vector<32x8xf32>, vector<2x8xf32> -> vector<2x8xf32>
    %c0_58 = arith.constant 0 : index
    %c0_59 = arith.constant 0 : index
    %146 = vector.load %arg13[%c0_58, %c0_59] : memref<1x8xf32, #tpu.memory_space<vmem>>, vector<1x8xf32>
    %147 = vector.broadcast %146 : vector<1x8xf32> to vector<2x8xf32>
    %148 = arith.addf %145, %147 : vector<2x8xf32>
    %c0_60 = arith.constant 0 : index
    %c0_61 = arith.constant 0 : index
    %149 = vector.load %arg14[%c0_60, %c0_61] : memref<2x8xf32, #tpu.memory_space<vmem>>, vector<2x8xf32>
    tpu.vector_store %arg14[%c0_60, %c0_61], %148 {strides = array<i32>} : memref<2x8xf32, #tpu.memory_space<vmem>>, vector<2x8xf32>,
    return
  }
  func.func @transform_0(%arg0: i32) -> (i32, i32, i32) {
    %c0_i32 = arith.constant 0 : i32
    %c0_i32_0 = arith.constant 0 : i32
    %c0_i32_1 = arith.constant 0 : i32
    return %arg0, %c0_i32, %c0_i32_0 : i32, i32, i32
  }
  func.func @transform_1(%arg0: i32) -> (i32, i32) {
    %c0_i32 = arith.constant 0 : i32
    %c0_i32_0 = arith.constant 0 : i32
    %c0_i32_1 = arith.constant 0 : i32
    return %c0_i32, %c0_i32_0 : i32, i32
  }
  func.func @transform_2(%arg0: i32) -> (i32, i32) {
    %c0_i32 = arith.constant 0 : i32
    %c0_i32_0 = arith.constant 0 : i32
    %c0_i32_1 = arith.constant 0 : i32
    return %c0_i32, %c0_i32_0 : i32, i32
  }
  func.func @transform_3(%arg0: i32) -> (i32, i32) {
    %c0_i32 = arith.constant 0 : i32
    %c0_i32_0 = arith.constant 0 : i32
    %c0_i32_1 = arith.constant 0 : i32
    return %c0_i32, %c0_i32_0 : i32, i32
  }
  func.func @transform_4(%arg0: i32) -> (i32, i32) {
    %c0_i32 = arith.constant 0 : i32
    %c0_i32_0 = arith.constant 0 : i32
    %c0_i32_1 = arith.constant 0 : i32
    return %c0_i32, %c0_i32_0 : i32, i32
  }
  func.func @transform_5(%arg0: i32) -> (i32, i32) {
    %c0_i32 = arith.constant 0 : i32
    %c0_i32_0 = arith.constant 0 : i32
    %c0_i32_1 = arith.constant 0 : i32
    return %c0_i32, %c0_i32_0 : i32, i32
  }
  func.func @transform_6(%arg0: i32) -> (i32, i32) {
    %c0_i32 = arith.constant 0 : i32
    %c0_i32_0 = arith.constant 0 : i32
    %c0_i32_1 = arith.constant 0 : i32
    return %c0_i32, %c0_i32_0 : i32, i32
  }
  func.func @transform_7(%arg0: i32) -> (i32, i32) {
    %c0_i32 = arith.constant 0 : i32
    %c0_i32_0 = arith.constant 0 : i32
    %c0_i32_1 = arith.constant 0 : i32
    return %c0_i32, %c0_i32_0 : i32, i32
  }
  func.func @transform_8(%arg0: i32) -> (i32, i32) {
    %c0_i32 = arith.constant 0 : i32
    %c0_i32_0 = arith.constant 0 : i32
    %c0_i32_1 = arith.constant 0 : i32
    return %c0_i32, %c0_i32_0 : i32, i32
  }
  func.func @transform_9(%arg0: i32) -> (i32, i32) {
    %c0_i32 = arith.constant 0 : i32
    %c0_i32_0 = arith.constant 0 : i32
    %c0_i32_1 = arith.constant 0 : i32
    return %c0_i32, %c0_i32_0 : i32, i32
  }
  func.func @transform_10(%arg0: i32) -> (i32, i32) {
    %c0_i32 = arith.constant 0 : i32
    %c0_i32_0 = arith.constant 0 : i32
    %c0_i32_1 = arith.constant 0 : i32
    return %c0_i32, %c0_i32_0 : i32, i32
  }
  func.func @transform_11(%arg0: i32) -> (i32, i32) {
    %c0_i32 = arith.constant 0 : i32
    %c0_i32_0 = arith.constant 0 : i32
    %c0_i32_1 = arith.constant 0 : i32
    return %c0_i32, %c0_i32_0 : i32, i32
  }
  func.func @transform_12(%arg0: i32) -> (i32, i32) {
    %c0_i32 = arith.constant 0 : i32
    %c0_i32_0 = arith.constant 0 : i32
    %c0_i32_1 = arith.constant 0 : i32
    return %c0_i32, %c0_i32_0 : i32, i32
  }
  func.func @transform_13(%arg0: i32) -> (i32, i32) {
    %c0_i32 = arith.constant 0 : i32
    %c0_i32_0 = arith.constant 0 : i32
    return %arg0, %c0_i32 : i32, i32
  }
}

</mosaic_0001>

<bundles_post_ra>
// kernel: tpu_custom_call.1
= control target key start
LH: loop header
LB: loop body
LE: loop exit
PB: predicated region body
PF: predicated region fallthrough
CT: control target
= control target key end

     0   :  { %18 = vsyncpa [#allocation3], 0  ;;  %s6817_s0 = inlined_call_operand.hbm [shape: f32[2,8,32], index: 0, kind: input, shape index: {}]   ;;  %s6818_s1 = inlined_call_operand.vmem [shape: f32[32,96], index: 1, kind: input, shape index: {}]   ;;  %s6819_s2 = inlined_call_operand.vmem [shape: f32[1,96], index: 2, kind: input, shape index: {}]   ;;  %s6820_s3 = inlined_call_operand.hbm [shape: f32[32,32], index: 3, kind: input, shape index: {}]   ;;  %s6821_s4 = inlined_call_operand.vmem [shape: f32[1,32], index: 4, kind: input, shape index: {}]   ;;  %s6822_s5 = inlined_call_operand.hbm [shape: f32[32,32], index: 5, kind: input, shape index: {}]   ;;  %s6823_s6 = inlined_call_operand.hbm [shape: f32[32,32], index: 6, kind: input, shape index: {}]   ;;  %s6824_s7 = inlined_call_operand.hbm [shape: f32[1,32], index: 7, kind: input, shape index: {}]   ;;  %s6825_s8 = inlined_call_operand.vmem [shape: f32[32,32], index: 8, kind: input, shape index: {}]   ;;  %s6826_s9 = inlined_call_operand.hbm [shape: f32[32,32], index: 9, kind: input, shape index: {}]   ;;  %s6827_s10 = inlined_call_operand.vmem [shape: f32[1,32], index: 10, kind: input, shape index: {}]   ;;  %s6828_s11 = inlined_call_operand.vmem [shape: f32[32,8], index: 11, kind: input, shape index: {}]   ;;  %s6829_s12 = inlined_call_operand.vmem [shape: f32[1,8], index: 12, kind: input, shape index: {}]   ;;  %s6830_s13 = inlined_call_operand.hbm [shape: f32[2,8], index: 13, kind: output, shape index: {}]  }
   0x1   :  { %19 = vsyncpa [#allocation6], 0 }
   0x2   :  { %20 = vsyncpa [#allocation9], 0 }
   0x3   :  { %21 = vsyncpa [#allocation12], 0 }
   0x4   :  { %22 = vsyncpa [#allocation4], 0  ;;  %s5974_s25 = smov [#allocation5]   ;;  %s5975_s27 = smov [#allocation8]  }
   0x5   :  { %s44_s26 = sshll.u32 %s5974_s25, 4  ;;  %s70_s28 = sshll.u32 %s5975_s27, 4  ;;  %s45_s26 = int_to_ptr.vmem [resolvable:$true] %s44_s26  ;;  %s6065_s28 = int_to_ptr.vmem [resolvable:$true] %s70_s28 }
   0x6   :  { %s5810_s14 = scalar_lea.hbm %s6820_s3, 512 }
   0x7   :  { %p5811_p0 = scmp.ne.s32.totalorder %s6820_s3, %s5810_s14  ;;  %p5814_p1 = scmp.lt.u32.totalorder %s5810_s14, %s6820_s3 }
   0x9   :  { %p5816_p2 = pnand %p5814_p1, %p5811_p0 }
   0xb   :  { %5819 = shalt.err (!%p5816_p2)
}
   0xc   :  { %s5820_s19 = scalar_lea.vmem %s45_s26, 512  ;;  %p5825_p4 = scmp.lt.s32.totalorder %s45_s26, %s45_s26 }
   0xd   :  { %p5821_p3 = scmp.ne.s32.totalorder %s45_s26, %s5820_s19  ;;  %p5826_p5 = scmp.lt.s32.totalorder %s5820_s19, %s5820_s19 }
   0xf   :  { %p5827_p6 = por %p5826_p5, %p5825_p4 }
  0x11   :  { %p5828_p7 = pnand %p5827_p6, %p5821_p3 }
  0x13   :  { %5831 = shalt.err (!%p5828_p7)
}
  0x14   :  { %s5976_s20 = smov 128   ;;  %s5977_s21 = smov 8  }
  0x15   :  { %50 = dma.hbm_to_vmem [thread:$0]  %s6820_s3, 512, %s45_s26, [#allocation6], %s5976_s20, %s5976_s20, %s5977_s21  }
  0x16   :  { %s5832_s27 = scalar_lea.hbm %s6823_s6, 512 }
  0x17   :  { %p5833_p8 = scmp.ne.s32.totalorder %s6823_s6, %s5832_s27  ;;  %p5836_p9 = scmp.lt.u32.totalorder %s5832_s27, %s6823_s6 }
  0x19   :  { %p5838_p10 = pnand %p5836_p9, %p5833_p8 }
  0x1b   :  { %5841 = shalt.err (!%p5838_p10)
}
  0x1c   :  { %s5842_s16 = scalar_lea.vmem %s6065_s28, 512  ;;  %p5847_p12 = scmp.lt.s32.totalorder %s6065_s28, %s6065_s28 }
  0x1d   :  { %p5843_p11 = scmp.ne.s32.totalorder %s6065_s28, %s5842_s16  ;;  %p5848_p13 = scmp.lt.s32.totalorder %s5842_s16, %s5842_s16 }
  0x1f   :  { %p5849_p0 = por %p5848_p13, %p5847_p12 }
  0x21   :  { %p5850_p1 = pnand %p5849_p0, %p5843_p11 }
  0x23   :  { %5853 = shalt.err (!%p5850_p1)
}
  0x24   :  { %76 = dma.hbm_to_vmem [thread:$0]  %s6823_s6, 512, %s6065_s28, [#allocation9], %s5976_s20, %s5976_s20, %s5977_s21  }
  0x25   :  { %s5978_s17 = smov [#allocation2]   ;;  %s5979_s19 = smov [#allocation7]  }
  0x26   :  { %s28_s18 = sshll.u32 %s5978_s17, 4  ;;  %s58_s22 = sshll.u32 %s5979_s19, 4  ;;  %s29_s18 = int_to_ptr.vmem [resolvable:$true] %s28_s18  ;;  %s6102_s22 = int_to_ptr.vmem [resolvable:$true] %s58_s22 }
  0x27   :  { %s5854_s25 = scalar_lea.hbm %s6817_s0, 256 }
  0x28   :  { %p5855_p2 = scmp.ne.s32.totalorder %s6817_s0, %s5854_s25  ;;  %p5858_p3 = scmp.lt.u32.totalorder %s5854_s25, %s6817_s0 }
  0x2a   :  { %p5860_p4 = pnand %p5858_p3, %p5855_p2 }
  0x2c   :  { %5863 = shalt.err (!%p5860_p4)
}
  0x2d   :  { %s5864_s6 = scalar_lea.vmem %s29_s18, 256  ;;  %p5869_p6 = scmp.lt.s32.totalorder %s29_s18, %s29_s18 }
  0x2e   :  { %p5865_p5 = scmp.ne.s32.totalorder %s29_s18, %s5864_s6  ;;  %p5870_p7 = scmp.lt.s32.totalorder %s5864_s6, %s5864_s6 }
  0x30   :  { %p5871_p8 = por %p5870_p7, %p5869_p6 }
  0x32   :  { %p5872_p9 = pnand %p5871_p8, %p5865_p5 }
  0x34   :  { %5875 = shalt.err (!%p5872_p9)
}
  0x35   :  { %34 = dma.hbm_to_vmem [thread:$0]  %s6817_s0, 256, %s29_s18, [#allocation3], %s5976_s20, %s5976_s20, %s5977_s21  }
  0x36   :  { %s5876_s26 = scalar_lea.hbm %s6822_s5, 512 }
  0x37   :  { %p5877_p10 = scmp.ne.s32.totalorder %s6822_s5, %s5876_s26  ;;  %p5880_p11 = scmp.lt.u32.totalorder %s5876_s26, %s6822_s5 }
  0x39   :  { %p5882_p12 = pnand %p5880_p11, %p5877_p10 }
  0x3b   :  { %5885 = shalt.err (!%p5882_p12)
}
  0x3c   :  { %s5886_s25 = scalar_lea.vmem %s6102_s22, 512  ;;  %p5891_p0 = scmp.lt.s32.totalorder %s6102_s22, %s6102_s22 }
  0x3d   :  { %p5887_p13 = scmp.ne.s32.totalorder %s6102_s22, %s5886_s25  ;;  %p5892_p1 = scmp.lt.s32.totalorder %s5886_s25, %s5886_s25 }
  0x3f   :  { %p5893_p2 = por %p5892_p1, %p5891_p0 }
  0x41   :  { %p5894_p3 = pnand %p5893_p2, %p5887_p13 }
  0x43   :  { %5897 = shalt.err (!%p5894_p3)
}
  0x44   :  { %64 = dma.hbm_to_vmem [thread:$0]  %s6822_s5, 512, %s6102_s22, [#allocation6], %s5976_s20, %s5976_s20, %s5977_s21  }
  0x45   :  { %s5980_s27 = smov [#allocation10]   ;;  %s5981_s30 = smov [#allocation11]  }
  0x46   :  { %s83_s29 = sshll.u32 %s5980_s27, 4  ;;  %s94_s14 = sshll.u32 %s5981_s30, 4  ;;  %s84_s29 = int_to_ptr.vmem [resolvable:$true] %s83_s29  ;;  %s6139_s14 = int_to_ptr.vmem [resolvable:$true] %s94_s14 }
  0x47   :  { %s5898_s15 = scalar_lea.hbm %s6824_s7, 16 }
  0x48   :  { %p5899_p4 = scmp.ne.s32.totalorder %s6824_s7, %s5898_s15  ;;  %p5902_p5 = scmp.lt.u32.totalorder %s5898_s15, %s6824_s7 }
  0x4a   :  { %p5904_p6 = pnand %p5902_p5, %p5899_p4 }
  0x4c   :  { %5907 = shalt.err (!%p5904_p6)
}
  0x4d   :  { %s5908_s5 = scalar_lea.vmem %s84_s29, 16  ;;  %s5912_s22 = scalar_lea.vmem %s84_s29, 32 }
  0x4e   :  { %p5909_p7 = scmp.ne.s32.totalorder %s84_s29, %s5908_s5  ;;  %p5913_p8 = scmp.lt.s32.totalorder %s84_s29, %s84_s29 }
  0x4f   :  { %p5914_p9 = scmp.lt.s32.totalorder %s5912_s22, %s5908_s5 }
  0x51   :  { %p5915_p10 = por %p5914_p9, %p5913_p8 }
  0x53   :  { %p5916_p11 = pnand %p5915_p10, %p5909_p7 }
  0x55   :  { %5919 = shalt.err (!%p5916_p11)
}
  0x56   :  { %86 = dma.hbm_to_vmem [thread:$0]  %s6824_s7, 16, %s84_s29, [#allocation9]  }
  0x57   :  { %s5920_s0 = scalar_lea.hbm %s6826_s9, 512 }
  0x58   :  { %p5921_p12 = scmp.ne.s32.totalorder %s6826_s9, %s5920_s0  ;;  %p5924_p13 = scmp.lt.u32.totalorder %s5920_s0, %s6826_s9 }
  0x5a   :  { %p5926_p0 = pnand %p5924_p13, %p5921_p12 }
  0x5c   :  { %5929 = shalt.err (!%p5926_p0)
}
  0x5d   :  { %s5930_s28 = scalar_lea.vmem %s6139_s14, 512  ;;  %p5935_p2 = scmp.lt.s32.totalorder %s6139_s14, %s6139_s14 }
  0x5e   :  { %p5931_p1 = scmp.ne.s32.totalorder %s6139_s14, %s5930_s28  ;;  %p5936_p3 = scmp.lt.s32.totalorder %s5930_s28, %s5930_s28 }
  0x60   :  { %p5937_p4 = por %p5936_p3, %p5935_p2 }
  0x62   :  { %p5938_p5 = pnand %p5937_p4, %p5931_p1 }
  0x64   :  { %5941 = shalt.err (!%p5938_p5)
}
  0x65   :  { %100 = dma.hbm_to_vmem [thread:$0]  %s6826_s9, 512, %s6139_s14, [#allocation12], %s5976_s20, %s5976_s20, %s5977_s21  }
  0x66   :  { %5964 = dma.done.wait [#allocation3], 256  }
  0x67   :  { %5965 = vsyncadd [#allocation3], 4294967040 }
  0x68   :  { %5966 = dma.done.wait [#allocation6], 1024  }
  0x69   :  { %5967 = vsyncadd [#allocation6], 4294966272 }
  0x6a   :  { %5968 = dma.done.wait [#allocation9], 528  }
  0x6b   :  { %5969 = vsyncadd [#allocation9], 4294966768 }
  0x6c   :  { %5970 = dma.done.wait [#allocation12], 512  }
  0x6d   :  { %5971 = vsyncadd [#allocation12], 4294966784  ;;  %vm138_vm0 = vcmask 261120   ;;  %v127_v0 = vld [vmem:[%s6818_s1] sm:$0xff]  ;;  %v128_v1 = vld [vmem:[%s6818_s1 + $0x8] sm:$0xff]  ;;  %s5982_s19 = smov 104   ;;  %v245_v22 = vlaneseq }
  0x6e   :  { %v129_v2 = vld [vmem:[%s6818_s1 + $0x10] sm:$0xff]  ;;  %v5551_v3 = vpack.c.bf16 %v128_v1, %v127_v0  ;;  %v130_v4 = vld [vmem:[%s6818_s1 + $0x18] sm:$0xff]  ;;  %v125_v5 = vld [vmem:[#allocation2] sm:$0xff]  ;;  %s5983_s1 = smov 120   ;;  %s5984_s23 = smov 112   ;;  %v5986_v19 = vmov 0.0  }
  0x6f   :  { %v5555_v6 = vpack.c.bf16 %v130_v4, %v129_v2  ;;  %5171 = vmatprep.mubr.msk.f32.mxu0 %vm138_vm0, %v125_v5  ;;  %v126_v7 = vld [vmem:[#allocation2 + $0x8] sm:$0xff]  ;;  %v4914_v8 = vld [vmem:[%s6819_s2] ss:$0 sm:$0xff]  ;;  %s5985_s24 = smov 96   ;;  %5174 = vmatprep.subr.mxu1 %v5986_v19  ;;  %s5987_s2 = smov 64   ;;  %vm5988_vm1 = vmmov 0  }
  0x70   :  { %5552 = vmatprep.subr.bf16.mxu0 %v5551_v3  ;;  %5176 = vmatprep.mubr.msk.f32.mxu1 %vm5988_vm1, %v5986_v19  ;;  %v5989_v20 = vmov 1983009808   ;;  %v246_v24 = vshrl.u32 %v245_v22, 7  ;;  %v5990_v25 = vmov 1934713408   ;;  %vm1104_vm2 = vcmask 64512  }
  0x71   :  { %5554 = vmatpush3.bf16.msra.mxu0 %v5551_v3  ;;  %v243_v21 = vunpack.c.l.s4 %v5989_v20  ;;  %v275_v26 = vunpack.c.l.s4 %v5990_v25  ;;  %s5991_s25 = smov 16   ;;  %s5992_s0 = smov 24   ;;  %vm2691_vm3 = vcmask 130048   ;;  %vm2694_vm4 = vcmask 195584  }
  0x72   :  { %5556 = vmatprep.subr.bf16.mxu0 %v5555_v6  ;;  %vm4894_vm5 = vcmask 58368  }
  0x73   :  { %v244_v23 = vunpack.c.0.s8 %v243_v21  ;;  %v276_v32 = vunpack.c.0.s8 %v275_v26 }
  0x75   :  { %5558 = vmatpush3.bf16.msra.mxu0 %v5555_v6  ;;  %v6222_v28 = vsub.s32 %v244_v23, %v246_v24  ;;  %v6237_v39 = vsub.s32 %v276_v32, %v246_v24 }
  0x76   :  { %5194 = vmatprep.subr.mxu0 %v5986_v19 }
  0x78   :  { %5172 = vmatmul.mubr.msk.f32.vlgmr.msra.gmra.mrb[0].mxu0 %vm138_vm0, %v126_v7 }
  0x79   :  { %5196 = vmatprep.mubr.msk.f32.mxu0 %vm5988_vm1, %v5986_v19 }
 0x14b   :  { %v5173_v9 = vpop.f32.mrb[0].mxu0 }
 0x14c   :  { %v211_v10 = vpop.f32.mrb[1].mxu0  ;;  %v6190_v12 = vadd.f32 %v5173_v9, %v4914_v8 }
 0x14d   :  { %v212_v11 = vadd.f32 %v4914_v8, %v211_v10 }
 0x14f   :  { %234 = vrot.lane.b32.xlu1 %v212_v11, %s5982_s19  ;;  %222 = vrot.lane.b32.xlu0 %v212_v11, %s5983_s1 }
 0x153   :  { %224 = vrot.lane.b32.xlu1 %v6190_v12, %s5983_s1  ;;  %228 = vrot.lane.b32.xlu0 %v212_v11, %s5984_s23 }
 0x157   :  { %236 = vrot.lane.b32.xlu1 %v6190_v12, %s5982_s19  ;;  %230 = vrot.lane.b32.xlu0 %v6190_v12, %s5984_s23 }
 0x15b   :  { %512 = vrot.lane.b32.xlu0 %v212_v11, %s5985_s24 }
 0x1c1   :  { %v6195_v13 = vpop.permute.xlu1 %234  ;;  %v6197_v14 = vpop.permute.xlu0 %222 }
 0x1c2   :  { %516 = vrot.lane.b32.xlu1 %v6197_v14, %s5985_s24  ;;  %v256_v29 = vcombine.low %v6197_v14, %v6195_v13  ;;  %v257_v31 = vcombine.high %v6197_v14, %v6195_v13 }
 0x1c4   :  { %v264_v34 = vrot.slane %v256_v29, %v6222_v28  ;;  %v271_v38 = vrot.slane %v257_v31, %v6222_v28 }
 0x1c5   :  { %v6200_v15 = vpop.permute.xlu0 %228  ;;  %v6204_v16 = vpop.permute.xlu1 %224 }
 0x1c6   :  { %524 = vrot.lane.b32.xlu1 %v6195_v13, %s5985_s24  ;;  %520 = vrot.lane.b32.xlu0 %v6200_v15, %s5985_s24  ;;  %v240_v27 = vcombine.low %v212_v11, %v6200_v15  ;;  %v241_v30 = vcombine.high %v212_v11, %v6200_v15 }
 0x1c8   :  { %v248_v33 = vrot.slane %v240_v27, %v6222_v28  ;;  %v255_v35 = vrot.slane %v241_v30, %v6222_v28 }
 0x1c9   :  { %v6208_v17 = vpop.permute.xlu1 %236  ;;  %v6210_v18 = vpop.permute.xlu0 %230 }
 0x1ca   :  { %518 = vrot.lane.b32.xlu1 %v6204_v16, %s5985_s24  ;;  %514 = vrot.lane.b32.xlu0 %v6190_v12, %s5985_s24  ;;  %v324_v36 = vcombine.low %v6204_v16, %v6208_v17  ;;  %v308_v37 = vcombine.low %v6190_v12, %v6210_v18  ;;  %v272_v40 = vcombine.low %v248_v33, %v264_v34 }
 0x1cb   :  { %v273_v41 = vcombine.high %v248_v33, %v264_v34  ;;  %v325_v42 = vcombine.high %v6204_v16, %v6208_v17  ;;  %v309_v43 = vcombine.high %v6190_v12, %v6210_v18  ;;  %v288_v44 = vcombine.low %v255_v35, %v271_v38 }
 0x1cc   :  { %v289_v45 = vcombine.high %v255_v35, %v271_v38  ;;  %v332_v46 = vrot.slane %v324_v36, %v6222_v28  ;;  %v316_v47 = vrot.slane %v308_v37, %v6222_v28  ;;  %v280_v48 = vrot.slane %v272_v40, %v6237_v39 }
 0x1cd   :  { %v287_v49 = vrot.slane %v273_v41, %v6237_v39  ;;  %v339_v50 = vrot.slane %v325_v42, %v6222_v28  ;;  %v323_v51 = vrot.slane %v309_v43, %v6222_v28  ;;  %v296_v52 = vrot.slane %v288_v44, %v6237_v39  ;;  %v513_v56 = vpop.permute.xlu0 %512 }
 0x1ce   :  { %526 = vrot.lane.b32.xlu1 %v6208_v17, %s5985_s24  ;;  %522 = vrot.lane.b32.xlu0 %v6210_v18, %s5985_s24  ;;  %v303_v53 = vrot.slane %v289_v45, %v6237_v39  ;;  %v340_v54 = vcombine.low %v316_v47, %v332_v46  ;;  %v341_v55 = vcombine.high %v316_v47, %v332_v46 }
 0x1cf   :  { %v376_v58 = vcombine.low %v280_v48, %v287_v49  ;;  %v356_v59 = vcombine.low %v323_v51, %v339_v50  ;;  %v357_v60 = vcombine.high %v323_v51, %v339_v50  ;;  %v4917_v61 = vcombine.high %v280_v48, %v287_v49 }
 0x1d0   :  { %v392_v62 = vcombine.low %v296_v52, %v303_v53  ;;  %v4918_v63 = vcombine.high %v296_v52, %v303_v53  ;;  %v348_v0 = vrot.slane %v340_v54, %v6237_v39  ;;  %v355_v1 = vrot.slane %v341_v55, %v6237_v39 }
 0x1d1   :  { %v6254_v8 = vrot.slane %v356_v59, %v6237_v39  ;;  %v371_v9 = vrot.slane %v357_v60, %v6237_v39  ;;  %v6258_v10 = vrot.slane %v376_v58, %v6222_v28  ;;  %v6265_v25 = vrot.slane %v4917_v61, %v6222_v28 }
 0x1d2   :  { %808 = vrot.lane.b32.xlu1 %v212_v11, %s5987_s2  ;;  %v444_v23 = vcombine.low %v348_v0, %v355_v1  ;;  %v6268_v26 = vrot.slane %v392_v62, %v6222_v28  ;;  %v6271_v27 = vrot.slane %v4918_v63, %v6222_v28  ;;  %v4919_v34 = vcombine.high %v348_v0, %v355_v1 }
 0x1d3   :  { %v460_v35 = vcombine.low %v6254_v8, %v371_v9  ;;  %v4920_v42 = vcombine.high %v6254_v8, %v371_v9  ;;  %v408_v44 = vcombine.low %v6258_v10, %v6265_v25 }
 0x1d4   :  { %v6279_v41 = vrot.slane %v444_v23, %v6222_v28  ;;  %v424_v45 = vcombine.low %v6268_v26, %v6271_v27  ;;  %v6295_v63 = vrot.slane %v4919_v34, %v6222_v28 }
 0x1d5   :  { %v6298_v0 = vrot.slane %v460_v35, %v6222_v28  ;;  %v416_v9 = vrot.slane %v408_v44, %v6237_v39 }
 0x234   :  { %v517_v57 = vpop.permute.xlu1 %516 }
 0x238   :  { %v525_v2 = vpop.permute.xlu1 %524  ;;  %v521_v3 = vpop.permute.xlu0 %520 }
 0x239   :  { %v552_v4 = vcombine.low %v517_v57, %v525_v2  ;;  %v553_v5 = vcombine.high %v517_v57, %v525_v2  ;;  %v536_v6 = vcombine.low %v513_v56, %v521_v3  ;;  %v537_v7 = vcombine.high %v513_v56, %v521_v3 }
 0x23b   :  { %v560_v11 = vrot.slane %v552_v4, %v6222_v28  ;;  %v567_v20 = vrot.slane %v553_v5, %v6222_v28  ;;  %v544_v21 = vrot.slane %v536_v6, %v6222_v28  ;;  %v551_v22 = vrot.slane %v537_v7, %v6222_v28 }
 0x23c   :  { %v519_v24 = vpop.permute.xlu1 %518  ;;  %v515_v33 = vpop.permute.xlu0 %514 }
 0x23d   :  { %v568_v29 = vcombine.low %v544_v21, %v560_v11  ;;  %v569_v30 = vcombine.high %v544_v21, %v560_v11  ;;  %v584_v31 = vcombine.low %v551_v22, %v567_v20  ;;  %v585_v32 = vcombine.high %v551_v22, %v567_v20 }
 0x23e   :  { %v432_v11 = vrot.slane %v424_v45, %v6237_v39 }
 0x23f   :  { %v576_v36 = vrot.slane %v568_v29, %v6237_v39  ;;  %v583_v37 = vrot.slane %v569_v30, %v6237_v39  ;;  %v592_v38 = vrot.slane %v584_v31, %v6237_v39  ;;  %v599_v40 = vrot.slane %v585_v32, %v6237_v39 }
 0x240   :  { %v527_v43 = vpop.permute.xlu1 %526  ;;  %v523_v50 = vpop.permute.xlu0 %522 }
 0x241   :  { %v672_v46 = vcombine.low %v576_v36, %v583_v37  ;;  %v4921_v47 = vcombine.high %v576_v36, %v583_v37  ;;  %v688_v48 = vcombine.low %v592_v38, %v599_v40  ;;  %v4922_v49 = vcombine.high %v592_v38, %v599_v40 }
 0x242   :  { %v620_v51 = vcombine.low %v519_v24, %v527_v43  ;;  %v621_v52 = vcombine.high %v519_v24, %v527_v43  ;;  %v604_v53 = vcombine.low %v515_v33, %v523_v50  ;;  %v605_v54 = vcombine.high %v515_v33, %v523_v50 }
 0x243   :  { %v679_v55 = vrot.slane %v672_v46, %v6222_v28  ;;  %v687_v56 = vrot.slane %v4921_v47, %v6222_v28  ;;  %v695_v57 = vrot.slane %v688_v48, %v6222_v28  ;;  %v703_v58 = vrot.slane %v4922_v49, %v6222_v28 }
 0x244   :  { %v628_v59 = vrot.slane %v620_v51, %v6222_v28  ;;  %v635_v60 = vrot.slane %v621_v52, %v6222_v28  ;;  %v612_v61 = vrot.slane %v604_v53, %v6222_v28  ;;  %v619_v62 = vrot.slane %v605_v54, %v6222_v28 }
 0x245   :  { %v704_v1 = vcombine.low %v679_v55, %v687_v56  ;;  %v720_v2 = vcombine.low %v695_v57, %v703_v58  ;;  %v475_v24 = vrot.slane %v4920_v42, %v6222_v28  ;;  %v705_v29 = vcombine.high %v679_v55, %v687_v56 }
 0x246   :  { %v636_v3 = vcombine.low %v612_v61, %v628_v59  ;;  %v637_v4 = vcombine.high %v612_v61, %v628_v59  ;;  %v652_v5 = vcombine.low %v619_v62, %v635_v60  ;;  %v653_v6 = vcombine.high %v619_v62, %v635_v60 }
 0x247   :  { %v712_v7 = vrot.slane %v704_v1, %v6237_v39  ;;  %v728_v8 = vrot.slane %v720_v2, %v6237_v39  ;;  %v721_v30 = vcombine.high %v695_v57, %v703_v58  ;;  %v409_v36 = vcombine.high %v6258_v10, %v6265_v25 }
 0x248   :  { %v644_v20 = vrot.slane %v636_v3, %v6237_v39  ;;  %v651_v21 = vrot.slane %v637_v4, %v6237_v39  ;;  %v660_v22 = vrot.slane %v652_v5, %v6237_v39  ;;  %v667_v23 = vrot.slane %v653_v6, %v6237_v39 }
 0x249   :  { %v736_v31 = vcombine.low %v712_v7, %v728_v8  ;;  %v425_v37 = vcombine.high %v6268_v26, %v6271_v27  ;;  %v440_v38 = vcombine.low %v416_v9, %v432_v11  ;;  %v476_v40 = vcombine.low %v6279_v41, %v6295_v63 }
 0x24a   :  { %v740_v32 = vcombine.low %v644_v20, %v651_v21  ;;  %v4923_v33 = vcombine.high %v644_v20, %v651_v21  ;;  %v756_v34 = vcombine.low %v660_v22, %v667_v23  ;;  %v4924_v35 = vcombine.high %v660_v22, %v667_v23 }
 0x24b   :  { %5175 = vmatpush3.xpose.msk.msra.mxu1 %vm1104_vm2, %v736_v31  ;;  %v737_v46 = vcombine.high %v712_v7, %v728_v8  ;;  %v719_v10 = vrot.slane %v705_v29, %v6237_v39  ;;  %v735_v25 = vrot.slane %v721_v30, %v6237_v39  ;;  %v492_v26 = vcombine.low %v6298_v0, %v475_v24 }
 0x24c   :  { %v747_v42 = vrot.slane %v740_v32, %v6222_v28  ;;  %v755_v43 = vrot.slane %v4923_v33, %v6222_v28  ;;  %v763_v44 = vrot.slane %v756_v34, %v6222_v28  ;;  %v771_v45 = vrot.slane %v4924_v35, %v6222_v28  ;;  %5179 = vmatprep.subr.mxu1 %v5986_v19 }
 0x24d   :  { %v423_v50 = vrot.slane %v409_v36, %v6237_v39  ;;  %v439_v51 = vrot.slane %v425_v37, %v6237_v39  ;;  %v441_v52 = vcombine.high %v416_v9, %v432_v11  ;;  %v477_v55 = vcombine.high %v6279_v41, %v6295_v63 }
 0x24e   :  { %v772_v27 = vcombine.low %v747_v42, %v755_v43  ;;  %v773_v47 = vcombine.high %v747_v42, %v755_v43  ;;  %v788_v48 = vcombine.low %v763_v44, %v771_v45  ;;  %v789_v49 = vcombine.high %v763_v44, %v771_v45  ;;  %5177 = vmatmul.mubr.msk.f32.vlgmr.msra.gmra.mrb[0].mxu1 %vm1104_vm2, %v440_v38 }
 0x24f   :  { %5180 = vmatpush3.xpose.msk.msra.mxu1 %vm1104_vm2, %v737_v46  ;;  %5181 = vmatprep.mubr.msk.f32.mxu1 %vm5988_vm1, %v5986_v19  ;;  %v738_v56 = vcombine.low %v719_v10, %v735_v25  ;;  %v484_v57 = vrot.slane %v476_v40, %v6237_v39  ;;  %v500_v58 = vrot.slane %v492_v26, %v6237_v39 }
 0x250   :  { %5184 = vmatprep.subr.mxu1 %v5986_v19  ;;  %v780_v53 = vrot.slane %v772_v27, %v6237_v39  ;;  %v796_v54 = vrot.slane %v788_v48, %v6237_v39  ;;  %v493_v59 = vcombine.high %v6298_v0, %v475_v24  ;;  %v787_v61 = vrot.slane %v773_v47, %v6237_v39 }
 0x251   :  { %v803_v62 = vrot.slane %v789_v49, %v6237_v39  ;;  %v442_v41 = vcombine.low %v423_v50, %v439_v51  ;;  %v508_v63 = vcombine.low %v484_v57, %v500_v58  ;;  %v739_v0 = vcombine.high %v719_v10, %v735_v25 }
 0x252   :  { %5182 = vmatmul.mubr.msk.f32.vlgmr.msra.gmra.mrb[2].mxu1 %vm1104_vm2, %v441_v52  ;;  %v804_v60 = vcombine.low %v780_v53, %v796_v54  ;;  %v491_v1 = vrot.slane %v477_v55, %v6237_v39  ;;  %v507_v2 = vrot.slane %v493_v59, %v6237_v39  ;;  %v443_v4 = vcombine.high %v423_v50, %v439_v51 }
 0x253   :  { %5185 = vmatpush3.xpose.msk.msra.mxu1 %vm1104_vm2, %v738_v56  ;;  %5186 = vmatprep.mubr.msk.f32.mxu1 %vm5988_vm1, %v5986_v19  ;;  %v806_v3 = vcombine.low %v787_v61, %v803_v62  ;;  %v805_v6 = vcombine.high %v780_v53, %v796_v54  ;;  %v509_v7 = vcombine.high %v484_v57, %v500_v58  ;;  %v809_v56 = vpop.permute.xlu1 %808 }
 0x254   :  { %5195 = vmatpush3.xpose.msk.msra.mxu0 %vm1104_vm2, %v804_v60  ;;  %5189 = vmatprep.subr.mxu1 %v5986_v19  ;;  %v510_v5 = vcombine.low %v491_v1, %v507_v2  ;;  %v807_v8 = vcombine.high %v787_v61, %v803_v62  ;;  %v511_v9 = vcombine.high %v491_v1, %v507_v2 }
 0x255   :  { %5204 = vmatprep.subr.mxu0 %v5986_v19 }
 0x256   :  { %5187 = vmatmul.mubr.msk.f32.vlgmr.msra.gmra.mrb[4].mxu1 %vm1104_vm2, %v442_v41 }
 0x257   :  { %5197 = vmatmul.mubr.msk.f32.vlgmr.msra.gmra.mrb[2].mxu0 %vm1104_vm2, %v508_v63  ;;  %5190 = vmatpush3.xpose.msk.msra.mxu1 %vm1104_vm2, %v739_v0 }
 0x258   :  { %5205 = vmatpush3.xpose.msk.msra.mxu0 %vm1104_vm2, %v806_v3  ;;  %5191 = vmatprep.mubr.msk.f32.mxu1 %vm5988_vm1, %v5986_v19 }
 0x259   :  { %5206 = vmatprep.mubr.msk.f32.mxu0 %vm5988_vm1, %v5986_v19  ;;  %5199 = vmatprep.subr.mxu1 %v5986_v19 }
 0x25a   :  { %5192 = vmatmul.mubr.msk.f32.vlgmr.msra.gmra.mrb[6].mxu1 %vm1104_vm2, %v443_v4  ;;  %5214 = vmatprep.subr.mxu0 %v5986_v19 }
 0x25b   :  { %5207 = vmatmul.mubr.msk.f32.vlgmr.msra.gmra.mrb[4].mxu0 %vm1104_vm2, %v510_v5  ;;  %5200 = vmatpush3.xpose.msk.msra.mxu1 %vm1104_vm2, %v805_v6 }
 0x25c   :  { %5201 = vmatprep.mubr.msk.f32.mxu1 %vm5988_vm1, %v5986_v19  ;;  %5209 = vmatprep.subr.mxu1 %v5986_v19 }
 0x25d   :  { %5216 = vmatprep.mubr.msk.f32.mxu0 %vm5988_vm1, %v5986_v19 }
 0x25e   :  { %5202 = vmatmul.mubr.msk.f32.vlgmr.msra.gmra.mrb[8].mxu1 %vm1104_vm2, %v509_v7 }
 0x25f   :  { %5210 = vmatpush3.xpose.msk.msra.mxu1 %vm1104_vm2, %v807_v8  ;;  %5211 = vmatprep.mubr.msk.f32.mxu1 %vm5988_vm1, %v5986_v19 }
 0x260   :  { %5219 = vmatprep.subr.mxu1 %v5986_v19 }
 0x262   :  { %5212 = vmatmul.mubr.msk.f32.vlgmr.msra.gmra.mrb[10].mxu1 %vm1104_vm2, %v511_v9 }
 0x263   :  { %5221 = vmatprep.mubr.msk.f32.mxu1 %vm5988_vm1, %v5986_v19 }
 0x321   :  { %v1177_v11 = vpop.f32.mrb[0].mxu1 }
 0x322   :  { %v1713_v20 = vmul.f32 0.35355338, %v1177_v11  ;;  %v5178_v21 = vpop.f32.mrb[1].mxu1 }
 0x324   :  { %v1721_v22 = vsel %vm1104_vm2, %v1713_v20, -inf }
 0x325   :  { %1722 = vmax.xlane.f32.xlu0 %v1721_v22  ;;  %v1253_v23 = vpop.f32.mrb[2].mxu1 }
 0x326   :  { %v5183_v24 = vpop.f32.mrb[3].mxu1  ;;  %v1714_v46 = vmul.f32 0.35355338, %v1253_v23 }
 0x328   :  { %v1724_v49 = vsel %vm1104_vm2, %v1714_v46, -inf }
 0x329   :  { %v1329_v29 = vpop.f32.mrb[4].mxu1 }
 0x32a   :  { %v1715_v30 = vmul.f32 0.35355338, %v1329_v29  ;;  %v1481_v31 = vpop.f32.mrb[2].mxu0  ;;  %v5188_v32 = vpop.f32.mrb[5].mxu1 }
 0x32b   :  { %v1717_v33 = vmul.f32 0.35355338, %v1481_v31  ;;  %v5198_v34 = vpop.f32.mrb[3].mxu0 }
 0x32c   :  { %v1727_v35 = vsel %vm1104_vm2, %v1715_v30, -inf }
 0x32d   :  { %1728 = vmax.xlane.f32.xlu0 %v1727_v35  ;;  %v1405_v36 = vpop.f32.mrb[6].mxu1  ;;  %v1733_v37 = vsel %vm1104_vm2, %v1717_v33, -inf }
 0x32e   :  { %v1716_v38 = vmul.f32 0.35355338, %v1405_v36  ;;  %1734 = vmax.xlane.f32.xlu1 %v1733_v37  ;;  %v1633_v40 = vpop.f32.mrb[4].mxu0  ;;  %v5193_v42 = vpop.f32.mrb[7].mxu1 }
 0x32f   :  { %v1719_v43 = vmul.f32 0.35355338, %v1633_v40  ;;  %v5208_v44 = vpop.f32.mrb[5].mxu0 }
 0x330   :  { %v1730_v45 = vsel %vm1104_vm2, %v1716_v38, -inf }
 0x331   :  { %1731 = vmax.xlane.f32.xlu0 %v1730_v45  ;;  %v1557_v10 = vpop.f32.mrb[8].mxu1  ;;  %v1739_v25 = vsel %vm1104_vm2, %v1719_v43, -inf }
 0x332   :  { %v1718_v26 = vmul.f32 0.35355338, %v1557_v10  ;;  %1740 = vmax.xlane.f32.xlu1 %v1739_v25  ;;  %v5203_v27 = vpop.f32.mrb[9].mxu1 }
 0x334   :  { %v1736_v47 = vsel %vm1104_vm2, %v1718_v26, -inf }
 0x335   :  { %1737 = vmax.xlane.f32.xlu0 %v1736_v47  ;;  %v1709_v48 = vpop.f32.mrb[10].mxu1 }
 0x336   :  { %v1720_v50 = vmul.f32 0.35355338, %v1709_v48  ;;  %1725 = vmax.xlane.f32.xlu1 %v1724_v49  ;;  %v5213_v51 = vpop.f32.mrb[11].mxu1 }
 0x338   :  { %v1742_v52 = vsel %vm1104_vm2, %v1720_v50, -inf }
 0x339   :  { %1743 = vmax.xlane.f32.xlu0 %v1742_v52 }
 0x347   :  { %816 = vrot.lane.b32.xlu1 %v6200_v15, %s5987_s2 }
 0x34b   :  { %820 = vrot.lane.b32.xlu1 %v6195_v13, %s5987_s2 }
 0x34f   :  { %810 = vrot.lane.b32.xlu1 %v6190_v12, %s5987_s2  ;;  %812 = vrot.lane.b32.xlu0 %v6197_v14, %s5987_s2 }
 0x3b2   :  { %v1723_v53 = vpop.xlane.xlu0 %1722 }
 0x3b3   :  { %v1745_v54 = vsub.f32 %v1713_v20, %v1723_v53 }
 0x3b5   :  { %v1753_v55 = vmul.f32 1.442695, %v1745_v54 }
 0x3b7   :  { %5746 = vpow2.f32 %v1753_v55 }
 0x3ba   :  { %v1729_v57 = vpop.xlane.xlu0 %1728 }
 0x3bb   :  { %v1735_v58 = vpop.xlane.xlu1 %1734  ;;  %v1747_v59 = vsub.f32 %v1715_v30, %v1729_v57 }
 0x3bc   :  { %v1749_v60 = vsub.f32 %v1717_v33, %v1735_v58 }
 0x3bd   :  { %v1757_v61 = vmul.f32 1.442695, %v1747_v59 }
 0x3be   :  { %v1761_v15 = vmul.f32 1.442695, %v1749_v60  ;;  %v1732_v62 = vpop.xlane.xlu0 %1731 }
 0x3bf   :  { %5748 = vpow2.f32 %v1757_v61  ;;  %v1741_v13 = vpop.xlane.xlu1 %1740  ;;  %v1748_v14 = vsub.f32 %v1716_v38, %v1732_v62 }
 0x3c0   :  { %5750 = vpow2.f32 %v1761_v15  ;;  %v1751_v41 = vsub.f32 %v1719_v43, %v1741_v13 }
 0x3c1   :  { %v6391_v12 = vpop.eup %5746  ;;  %v1759_v6 = vmul.f32 1.442695, %v1748_v14 }
 0x3c2   :  { %v1765_v63 = vmul.f32 1.442695, %v1751_v41  ;;  %v1738_v0 = vpop.xlane.xlu0 %1737  ;;  %v1769_v1 = vsel %vm1104_vm2, %v6391_v12, 0.0 }
 0x3c3   :  { %v1726_v2 = vpop.xlane.xlu1 %1725  ;;  %v1750_v3 = vsub.f32 %v1718_v26, %v1738_v0  ;;  %1770 = vadd.xlane.f32.xlu1 %v1769_v1 }
 0x3c4   :  { %5752 = vpow2.f32 %v1765_v63  ;;  %v1746_v4 = vsub.f32 %v1714_v46, %v1726_v2 }
 0x3c5   :  { %v1763_v5 = vmul.f32 1.442695, %v1750_v3 }
 0x3c6   :  { %v1755_v7 = vmul.f32 1.442695, %v1746_v4  ;;  %v1744_v8 = vpop.xlane.xlu0 %1743 }
 0x3c7   :  { %5754 = vpow2.f32 %v1763_v5  ;;  %v817_v9 = vpop.permute.xlu1 %816  ;;  %v1752_v11 = vsub.f32 %v1720_v50, %v1744_v8 }
 0x3c8   :  { %5756 = vpow2.f32 %v1755_v7  ;;  %v832_v21 = vcombine.low %v809_v56, %v817_v9  ;;  %v833_v23 = vcombine.high %v809_v56, %v817_v9 }
 0x3c9   :  { %v6395_v20 = vpop.eup %5748  ;;  %5758 = vpow2.f32 %v1759_v6  ;;  %v1767_v24 = vmul.f32 1.442695, %v1752_v11 }
 0x3ca   :  { %v6397_v22 = vpop.eup %5750  ;;  %v813_v29 = vpop.permute.xlu0 %812  ;;  %v1775_v30 = vsel %vm1104_vm2, %v6395_v20, 0.0  ;;  %v840_v35 = vrot.slane %v832_v21, %v6222_v28  ;;  %v847_v37 = vrot.slane %v833_v23, %v6222_v28 }
 0x3cb   :  { %v821_v31 = vpop.permute.xlu1 %820  ;;  %v1781_v32 = vsel %vm1104_vm2, %v6397_v22, 0.0  ;;  %1776 = vadd.xlane.f32.xlu1 %v1775_v30  ;;  %5760 = vpow2.f32 %v1767_v24 }
 0x3cc   :  { %v848_v33 = vcombine.low %v813_v29, %v821_v31  ;;  %v849_v34 = vcombine.high %v813_v29, %v821_v31  ;;  %1782 = vadd.xlane.f32.xlu0 %v1781_v32 }
 0x3ce   :  { %v6404_v36 = vpop.eup %5752  ;;  %v856_v38 = vrot.slane %v848_v33, %v6222_v28  ;;  %v863_v40 = vrot.slane %v849_v34, %v6222_v28 }
 0x3cf   :  { %v1787_v42 = vsel %vm1104_vm2, %v6404_v36, 0.0  ;;  %v811_v7 = vpop.permute.xlu1 %810 }
 0x3d0   :  { %v864_v43 = vcombine.low %v840_v35, %v856_v38  ;;  %v865_v44 = vcombine.high %v840_v35, %v856_v38  ;;  %v880_v45 = vcombine.low %v847_v37, %v863_v40  ;;  %v881_v46 = vcombine.high %v847_v37, %v863_v40  ;;  %1788 = vadd.xlane.f32.xlu0 %v1787_v42 }
 0x3d1   :  { %v6411_v10 = vpop.eup %5754 }
 0x3d2   :  { %v6413_v25 = vpop.eup %5756  ;;  %v872_v26 = vrot.slane %v864_v43, %v6237_v39  ;;  %v879_v27 = vrot.slane %v865_v44, %v6237_v39  ;;  %v888_v47 = vrot.slane %v880_v45, %v6237_v39  ;;  %v895_v48 = vrot.slane %v881_v46, %v6237_v39 }
 0x3d3   :  { %v1772_v49 = vsel %vm1104_vm2, %v6413_v25, 0.0  ;;  %v1784_v50 = vsel %vm1104_vm2, %v6411_v10, 0.0  ;;  %v6423_v51 = vpop.eup %5758 }
 0x3d4   :  { %v968_v52 = vcombine.low %v872_v26, %v879_v27  ;;  %v4925_v53 = vcombine.high %v872_v26, %v879_v27  ;;  %v984_v54 = vcombine.low %v888_v47, %v895_v48  ;;  %v4926_v55 = vcombine.high %v888_v47, %v895_v48  ;;  %1773 = vadd.xlane.f32.xlu0 %v1772_v49 }
 0x3d5   :  { %1785 = vadd.xlane.f32.xlu1 %v1784_v50  ;;  %v1778_v60 = vsel %vm1104_vm2, %v6423_v51, 0.0  ;;  %v6431_v61 = vpop.eup %5760 }
 0x3d6   :  { %v975_v56 = vrot.slane %v968_v52, %v6222_v28  ;;  %v983_v57 = vrot.slane %v4925_v53, %v6222_v28  ;;  %v991_v58 = vrot.slane %v984_v54, %v6222_v28  ;;  %v999_v59 = vrot.slane %v4926_v55, %v6222_v28 }
 0x3d7   :  { %v1790_v2 = vsel %vm1104_vm2, %v6431_v61, 0.0 }
 0x3d8   :  { %1779 = vadd.xlane.f32.xlu0 %v1778_v60  ;;  %v1000_v15 = vcombine.low %v975_v56, %v983_v57  ;;  %v1016_v62 = vcombine.low %v991_v58, %v999_v59  ;;  %v1001_v13 = vcombine.high %v975_v56, %v983_v57  ;;  %v1017_v41 = vcombine.high %v991_v58, %v999_v59 }
 0x3da   :  { %v1008_v63 = vrot.slane %v1000_v15, %v6237_v39  ;;  %v1024_v14 = vrot.slane %v1016_v62, %v6237_v39  ;;  %v1015_v0 = vrot.slane %v1001_v13, %v6237_v39  ;;  %v1031_v1 = vrot.slane %v1017_v41, %v6237_v39 }
 0x3dc   :  { %1791 = vadd.xlane.f32.xlu0 %v1790_v2  ;;  %v1032_v3 = vcombine.low %v1008_v63, %v1024_v14  ;;  %v1033_v4 = vcombine.high %v1008_v63, %v1024_v14  ;;  %v1034_v5 = vcombine.low %v1015_v0, %v1031_v1  ;;  %v1035_v6 = vcombine.high %v1015_v0, %v1031_v1 }
 0x3de   :  { %5215 = vmatpush3.msra.mxu0 %v1032_v3  ;;  %5220 = vmatpush3.msra.mxu1 %v1033_v4 }
 0x3df   :  { %5224 = vmatprep.subr.mxu0 %v5986_v19  ;;  %5229 = vmatprep.subr.mxu1 %v5986_v19 }
 0x3e6   :  { %818 = vrot.lane.b32.xlu1 %v6210_v18, %s5987_s2 }
 0x3ea   :  { %822 = vrot.lane.b32.xlu1 %v6208_v17, %s5987_s2 }
 0x3f2   :  { %814 = vrot.lane.b32.xlu0 %v6204_v16, %s5987_s2 }
 0x450   :  { %v1771_v8 = vpop.xlane.xlu1 %1770 }
 0x451   :  { %5762 = vrcp.f32 %v1771_v8 }
 0x458   :  { %v1777_v9 = vpop.xlane.xlu1 %1776 }
 0x459   :  { %5764 = vrcp.f32 %v1777_v9  ;;  %v1783_v11 = vpop.xlane.xlu0 %1782 }
 0x45b   :  { %v5763_v21 = vpop.eup %5762 }
 0x45c   :  { %v1801_v23 = vmul.f32 %v5763_v21, %v6391_v12 }
 0x45d   :  { %v1789_v24 = vpop.xlane.xlu0 %1788 }
 0x45e   :  { %5217 = vmatmul.mubr.msk.f32.vlgmr.msra.gmra.mrb[6].mxu0 %vm1104_vm2, %v1801_v23 }
 0x45f   :  { %5225 = vmatpush3.msra.mxu0 %v1034_v5  ;;  %5226 = vmatprep.mubr.msk.f32.mxu0 %vm5988_vm1, %v5986_v19 }
 0x460   :  { %5234 = vmatprep.subr.mxu0 %v5986_v19 }
 0x461   :  { %v1774_v17 = vpop.xlane.xlu0 %1773 }
 0x462   :  { %v1786_v16 = vpop.xlane.xlu1 %1785  ;;  %5766 = vrcp.f32 %v1774_v17 }
 0x463   :  { %v5765_v18 = vpop.eup %5764 }
 0x464   :  { %v1803_v29 = vmul.f32 %v5765_v18, %v6395_v20 }
 0x465   :  { %v1780_v30 = vpop.xlane.xlu0 %1779 }
 0x466   :  { %5768 = vrcp.f32 %v1780_v30  ;;  %5227 = vmatmul.mubr.msk.f32.vlgmr.msra.gmra.mrb[8].mxu0 %vm1104_vm2, %v1803_v29  ;;  %v819_v12 = vpop.permute.xlu1 %818 }
 0x467   :  { %5236 = vmatprep.mubr.msk.f32.mxu0 %vm5988_vm1, %v5986_v19  ;;  %v900_v32 = vcombine.low %v811_v7, %v819_v12  ;;  %v901_v34 = vcombine.high %v811_v7, %v819_v12  ;;  %5770 = vrcp.f32 %v1783_v11 }
 0x468   :  { %5772 = vrcp.f32 %v1786_v16 }
 0x469   :  { %v1792_v31 = vpop.xlane.xlu0 %1791  ;;  %v908_v20 = vrot.slane %v900_v32, %v6222_v28  ;;  %v915_v44 = vrot.slane %v901_v34, %v6222_v28  ;;  %5774 = vrcp.f32 %v1789_v24 }
 0x46a   :  { %v823_v37 = vpop.permute.xlu1 %822  ;;  %5776 = vrcp.f32 %v1792_v31 }
 0x46c   :  { %v5767_v33 = vpop.eup %5766 }
 0x46d   :  { %v1802_v35 = vmul.f32 %v5767_v33, %v6413_v25  ;;  %v815_v38 = vpop.permute.xlu0 %814 }
 0x46e   :  { %v916_v40 = vcombine.low %v815_v38, %v823_v37  ;;  %v917_v42 = vcombine.high %v815_v38, %v823_v37 }
 0x46f   :  { %5222 = vmatmul.mubr.msk.f32.vlgmr.msra.gmra.mrb[12].mxu1 %vm1104_vm2, %v1802_v35 }
 0x470   :  { %v5769_v43 = vpop.eup %5768  ;;  %v924_v45 = vrot.slane %v916_v40, %v6222_v28  ;;  %v931_v46 = vrot.slane %v917_v42, %v6222_v28  ;;  %5230 = vmatpush3.msra.mxu1 %v1035_v6  ;;  %5231 = vmatprep.mubr.msk.f32.mxu1 %vm5988_vm1, %v5986_v19 }
 0x471   :  { %v1804_v25 = vmul.f32 %v5769_v43, %v6423_v51  ;;  %5239 = vmatprep.subr.mxu1 %v5986_v19  ;;  %v5771_v15 = vpop.eup %5770 }
 0x472   :  { %v932_v26 = vcombine.low %v908_v20, %v924_v45  ;;  %v933_v27 = vcombine.high %v908_v20, %v924_v45  ;;  %v948_v47 = vcombine.low %v915_v44, %v931_v46  ;;  %v949_v48 = vcombine.high %v915_v44, %v931_v46  ;;  %v5773_v14 = vpop.eup %5772 }
 0x473   :  { %5232 = vmatmul.mubr.msk.f32.vlgmr.msra.gmra.mrb[14].mxu1 %vm1104_vm2, %v1804_v25  ;;  %v5775_v2 = vpop.eup %5774  ;;  %v1805_v8 = vmul.f32 %v5771_v15, %v6397_v22  ;;  %v1806_v9 = vmul.f32 %v5773_v14, %v6411_v10 }
 0x474   :  { %v940_v49 = vrot.slane %v932_v26, %v6237_v39  ;;  %v947_v50 = vrot.slane %v933_v27, %v6237_v39  ;;  %v956_v52 = vrot.slane %v948_v47, %v6237_v39  ;;  %v963_v53 = vrot.slane %v949_v48, %v6237_v39  ;;  %5241 = vmatprep.mubr.msk.f32.mxu1 %vm5988_vm1, %v5986_v19  ;;  %v5777_v7 = vpop.eup %5776 }
 0x475   :  { %v1807_v23 = vmul.f32 %v5775_v2, %v6404_v36  ;;  %v1808_v24 = vmul.f32 %v5777_v7, %v6431_v61 }
 0x476   :  { %v1036_v51 = vcombine.low %v940_v49, %v947_v50  ;;  %v4927_v54 = vcombine.high %v940_v49, %v947_v50  ;;  %v1052_v55 = vcombine.low %v956_v52, %v963_v53  ;;  %v4928_v56 = vcombine.high %v956_v52, %v963_v53 }
 0x478   :  { %v1043_v57 = vrot.slane %v1036_v51, %v6222_v28  ;;  %v1051_v58 = vrot.slane %v4927_v54, %v6222_v28  ;;  %v1059_v59 = vrot.slane %v1052_v55, %v6222_v28  ;;  %v1067_v60 = vrot.slane %v4928_v56, %v6222_v28 }
 0x47a   :  { %v1068_v62 = vcombine.low %v1043_v57, %v1051_v58  ;;  %v1084_v13 = vcombine.low %v1059_v59, %v1067_v60  ;;  %v1069_v41 = vcombine.high %v1043_v57, %v1051_v58  ;;  %v1085_v63 = vcombine.high %v1059_v59, %v1067_v60 }
 0x47c   :  { %v1076_v0 = vrot.slane %v1068_v62, %v6237_v39  ;;  %v1092_v1 = vrot.slane %v1084_v13, %v6237_v39  ;;  %v1083_v3 = vrot.slane %v1069_v41, %v6237_v39  ;;  %v1099_v4 = vrot.slane %v1085_v63, %v6237_v39 }
 0x47e   :  { %v1100_v5 = vcombine.low %v1076_v0, %v1092_v1  ;;  %v1101_v6 = vcombine.high %v1076_v0, %v1092_v1  ;;  %v1102_v11 = vcombine.low %v1083_v3, %v1099_v4  ;;  %v1103_v21 = vcombine.high %v1083_v3, %v1099_v4 }
 0x480   :  { %5235 = vmatpush3.msra.mxu0 %v1100_v5  ;;  %5240 = vmatpush3.msra.mxu1 %v1101_v6 }
 0x481   :  { %5237 = vmatmul.mubr.msk.f32.vlgmr.msra.gmra.mrb[10].mxu0 %vm1104_vm2, %v1805_v8  ;;  %5242 = vmatmul.mubr.msk.f32.vlgmr.msra.gmra.mrb[16].mxu1 %vm1104_vm2, %v1806_v9 }
 0x482   :  { %5244 = vmatprep.subr.mxu0 %v5986_v19  ;;  %5249 = vmatprep.subr.mxu1 %v5986_v19 }
 0x483   :  { %5245 = vmatpush3.msra.mxu0 %v1102_v11  ;;  %5250 = vmatpush3.msra.mxu1 %v1103_v21 }
 0x484   :  { %5246 = vmatprep.mubr.msk.f32.mxu0 %vm5988_vm1, %v5986_v19  ;;  %5251 = vmatprep.mubr.msk.f32.mxu1 %vm5988_vm1, %v5986_v19 }
 0x485   :  { %5247 = vmatmul.mubr.msk.f32.vlgmr.msra.gmra.mrb[12].mxu0 %vm1104_vm2, %v1807_v23  ;;  %5252 = vmatmul.mubr.msk.f32.vlgmr.msra.gmra.mrb[18].mxu1 %vm1104_vm2, %v1808_v24 }
 0x531   :  { %v1878_v22 = vpop.f32.mrb[6].mxu0 }
 0x532   :  { %v5218_v10 = vpop.f32.mrb[7].mxu0 }
 0x539   :  { %v2024_v17 = vpop.f32.mrb[8].mxu0 }
 0x53a   :  { %v2393_v16 = vcombine.low %v1878_v22, %v2024_v17  ;;  %v2394_v18 = vcombine.high %v1878_v22, %v2024_v17  ;;  %v5228_v36 = vpop.f32.mrb[9].mxu0 }
 0x53c   :  { %v2401_v33 = vrot.slane %v2393_v16, %v6222_v28  ;;  %v2408_v34 = vrot.slane %v2394_v18, %v6222_v28  ;;  %v2697_v16 = vld [vmem:[#allocation5] sm:$0xff]  ;;  %v2698_v18 = vld [vmem:[#allocation5 + $0x8] sm:$0xff] }
 0x53d   :  { %v5559_v36 = vpack.c.bf16 %v2698_v18, %v2697_v16 }
 0x53f   :  { %5560 = vmatprep.subr.bf16.mxu0 %v5559_v36 }
 0x540   :  { %5562 = vmatpush3.bf16.msra.mxu0 %v5559_v36 }
 0x542   :  { %v1951_v29 = vpop.f32.mrb[12].mxu1 }
 0x543   :  { %v5223_v61 = vpop.f32.mrb[13].mxu1 }
 0x546   :  { %v2097_v30 = vpop.f32.mrb[14].mxu1 }
 0x547   :  { %v2409_v12 = vcombine.low %v1951_v29, %v2097_v30  ;;  %v2410_v31 = vcombine.high %v1951_v29, %v2097_v30  ;;  %v5233_v32 = vpop.f32.mrb[15].mxu1 }
 0x549   :  { %v2417_v35 = vrot.slane %v2409_v12, %v6222_v28  ;;  %v2424_v37 = vrot.slane %v2410_v31, %v6222_v28 }
 0x54b   :  { %v2425_v38 = vcombine.low %v2401_v33, %v2417_v35  ;;  %v2426_v40 = vcombine.high %v2401_v33, %v2417_v35  ;;  %v2441_v42 = vcombine.low %v2408_v34, %v2424_v37  ;;  %v2442_v20 = vcombine.high %v2408_v34, %v2424_v37  ;;  %v2699_v35 = vld [vmem:[#allocation5 + $0x10] sm:$0xff]  ;;  %v2700_v37 = vld [vmem:[#allocation5 + $0x18] sm:$0xff] }
 0x54d   :  { %v2433_v43 = vrot.slane %v2425_v38, %v6237_v39  ;;  %v2440_v44 = vrot.slane %v2426_v40, %v6237_v39  ;;  %v2449_v45 = vrot.slane %v2441_v42, %v6237_v39  ;;  %v2456_v46 = vrot.slane %v2442_v20, %v6237_v39 }
 0x54e   :  { %v5563_v38 = vpack.c.bf16 %v2700_v37, %v2699_v35 }
 0x54f   :  { %v2529_v25 = vcombine.low %v2433_v43, %v2440_v44  ;;  %v4953_v26 = vcombine.high %v2433_v43, %v2440_v44  ;;  %v2545_v27 = vcombine.low %v2449_v45, %v2456_v46  ;;  %v4954_v47 = vcombine.high %v2449_v45, %v2456_v46 }
 0x550   :  { %5564 = vmatprep.subr.bf16.mxu0 %v5563_v38 }
 0x551   :  { %v2536_v48 = vrot.slane %v2529_v25, %v6222_v28  ;;  %v2544_v49 = vrot.slane %v4953_v26, %v6222_v28  ;;  %v2552_v50 = vrot.slane %v2545_v27, %v6222_v28  ;;  %v2560_v52 = vrot.slane %v4954_v47, %v6222_v28  ;;  %5566 = vmatpush3.bf16.msra.mxu0 %v5563_v38 }
 0x553   :  { %v2561_v53 = vcombine.low %v2536_v48, %v2544_v49  ;;  %v2577_v51 = vcombine.low %v2552_v50, %v2560_v52  ;;  %v2562_v54 = vcombine.high %v2536_v48, %v2544_v49  ;;  %v2578_v55 = vcombine.high %v2552_v50, %v2560_v52 }
 0x554   :  { %v2170_v56 = vpop.f32.mrb[10].mxu0  ;;  %v2243_v57 = vpop.f32.mrb[16].mxu1 }
 0x555   :  { %v5238_v58 = vpop.f32.mrb[11].mxu0  ;;  %v5243_v59 = vpop.f32.mrb[17].mxu1  ;;  %v6508_v60 = vrot.slane %v2561_v53, %v6237_v39  ;;  %v6511_v15 = vrot.slane %v2577_v51, %v6237_v39  ;;  %v2576_v62 = vrot.slane %v2562_v54, %v6237_v39  ;;  %v2592_v13 = vrot.slane %v2578_v55, %v6237_v39 }
 0x557   :  { %v2594_v41 = vcombine.high %v6508_v60, %v6511_v15  ;;  %v2593_v63 = vcombine.low %v6508_v60, %v6511_v15  ;;  %v2595_v14 = vcombine.low %v2576_v62, %v2592_v13  ;;  %v2596_v0 = vcombine.high %v2576_v62, %v2592_v13  ;;  %v2855_v60 = vld [vmem:[#allocation7] sm:$0xff]  ;;  %v2856_v15 = vld [vmem:[#allocation7 + $0x8] sm:$0xff] }
 0x558   :  { %v2316_v1 = vpop.f32.mrb[12].mxu0  ;;  %v2389_v2 = vpop.f32.mrb[18].mxu1 }
 0x559   :  { %v2461_v3 = vcombine.low %v2170_v56, %v2316_v1  ;;  %v2462_v4 = vcombine.high %v2170_v56, %v2316_v1  ;;  %v2477_v5 = vcombine.low %v2243_v57, %v2389_v2  ;;  %v2478_v6 = vcombine.high %v2243_v57, %v2389_v2  ;;  %2667 = vrot.lane.b32.xlu0 %v2594_v41, %s5977_s21  ;;  %v5248_v7 = vpop.f32.mrb[13].mxu0  ;;  %v5253_v8 = vpop.f32.mrb[19].mxu1  ;;  %v2857_v1 = vld [vmem:[#allocation7 + $0x10] sm:$0xff]  ;;  %v2858_v2 = vld [vmem:[#allocation7 + $0x18] sm:$0xff] }
 0x55a   :  { %v5993_v7 = vmov 0.0|0.0   ;;  %v3033_v8 = vld [vmem:[#allocation8 + $0x10] sm:$0xff] }
 0x55b   :  { %v2469_v9 = vrot.slane %v2461_v3, %v6222_v28  ;;  %v2476_v11 = vrot.slane %v2462_v4, %v6222_v28  ;;  %v2485_v21 = vrot.slane %v2477_v5, %v6222_v28  ;;  %v2492_v23 = vrot.slane %v2478_v6, %v6222_v28  ;;  %v3031_v4 = vld [vmem:[#allocation8] sm:$0xff]  ;;  %v3032_v5 = vld [vmem:[#allocation8 + $0x8] sm:$0xff]  ;;  %5575 = vmatprep.subr.bf16.mxu0 %v5993_v7 }
 0x55c   :  { %v5571_v3 = vpack.c.bf16 %v2858_v2, %v2857_v1  ;;  %v6550_v6 = vpack.c.bf16 %v3032_v5, %v3031_v4 }
 0x55d   :  { %v2493_v24 = vcombine.low %v2469_v9, %v2485_v21  ;;  %v2494_v22 = vcombine.high %v2469_v9, %v2485_v21  ;;  %v2509_v10 = vcombine.low %v2476_v11, %v2492_v23  ;;  %v2510_v17 = vcombine.high %v2476_v11, %v2492_v23  ;;  %2675 = vrot.lane.b32.xlu0 %v2595_v14, %s5991_s25  ;;  %v3034_v9 = vld [vmem:[#allocation8 + $0x18] sm:$0xff]  ;;  %v4957_v21 = vld [vmem:[%s6821_s4] ss:$0 sm:$0xff] }
 0x55e   :  { %v6556_v11 = vpack.c.bf16 %v3034_v9, %v3033_v8  ;;  %v6643_v9 = vld [vmem:[%s6827_s10] ss:$0 sm:$0xff] }
 0x55f   :  { %v2501_v29 = vrot.slane %v2493_v24, %v6237_v39  ;;  %v2508_v61 = vrot.slane %v2494_v22, %v6237_v39  ;;  %v2517_v30 = vrot.slane %v2509_v10, %v6237_v39  ;;  %v2524_v12 = vrot.slane %v2510_v17, %v6237_v39 }
 0x561   :  { %2683 = vrot.lane.b32.xlu0 %v2596_v0, %s5992_s0  ;;  %v2597_v31 = vcombine.low %v2501_v29, %v2508_v61  ;;  %v4955_v32 = vcombine.high %v2501_v29, %v2508_v61  ;;  %v2613_v33 = vcombine.low %v2517_v30, %v2524_v12  ;;  %v4956_v34 = vcombine.high %v2517_v30, %v2524_v12 }
 0x563   :  { %v2604_v40 = vrot.slane %v2597_v31, %v6222_v28  ;;  %v2612_v42 = vrot.slane %v4955_v32, %v6222_v28  ;;  %v2620_v20 = vrot.slane %v2613_v33, %v6222_v28  ;;  %v2628_v43 = vrot.slane %v4956_v34, %v6222_v28 }
 0x565   :  { %v2629_v44 = vcombine.low %v2604_v40, %v2612_v42  ;;  %v2645_v45 = vcombine.low %v2620_v20, %v2628_v43  ;;  %v2630_v46 = vcombine.high %v2604_v40, %v2612_v42  ;;  %v2646_v25 = vcombine.high %v2620_v20, %v2628_v43 }
 0x567   :  { %v2637_v26 = vrot.slane %v2629_v44, %v6237_v39  ;;  %v2653_v27 = vrot.slane %v2645_v45, %v6237_v39  ;;  %v2644_v47 = vrot.slane %v2630_v46, %v6237_v39  ;;  %v2660_v48 = vrot.slane %v2646_v25, %v6237_v39 }
 0x569   :  { %v2662_v49 = vcombine.high %v2637_v26, %v2653_v27  ;;  %v2661_v50 = vcombine.low %v2637_v26, %v2653_v27  ;;  %v2663_v52 = vcombine.low %v2644_v47, %v2660_v48  ;;  %v2664_v53 = vcombine.high %v2644_v47, %v2660_v48 }
 0x56b   :  { %2669 = vrot.lane.b32.xlu1 %v2662_v49, %s5977_s21  ;;  %v3039_v49 = vld [vmem:[#allocation11] sm:$0xff] }
 0x56f   :  { %2677 = vrot.lane.b32.xlu1 %v2663_v52, %s5991_s25 }
 0x573   :  { %2685 = vrot.lane.b32.xlu1 %v2664_v53, %s5992_s0 }
 0x5cb   :  { %v2668_v51 = vpop.permute.xlu0 %2667 }
 0x5cc   :  { %v2689_v55 = vsel %vm1104_vm2, %v2593_v63, %v2668_v51  ;;  %v5567_v63 = vpack.c.bf16 %v2856_v15, %v2855_v60 }
 0x5ce   :  { %5568 = vmatprep.subr.bf16.mxu1 %v5567_v63 }
 0x5cf   :  { %v2676_v54 = vpop.permute.xlu0 %2675  ;;  %5570 = vmatpush3.bf16.msra.mxu1 %v5567_v63 }
 0x5d0   :  { %v2692_v56 = vsel %vm2691_vm3, %v2689_v55, %v2676_v54  ;;  %5572 = vmatprep.subr.bf16.mxu1 %v5571_v3  ;;  %v3041_v54 = vld [vmem:[#allocation11 + $0x10] sm:$0xff]  ;;  %v3042_v55 = vld [vmem:[#allocation11 + $0x18] sm:$0xff] }
 0x5d3   :  { %v2684_v57 = vpop.permute.xlu0 %2683  ;;  %5574 = vmatpush3.bf16.msra.mxu1 %v5571_v3 }
 0x5d4   :  { %v2695_v58 = vsel %vm2694_vm4, %v2692_v56, %v2684_v57  ;;  %5581 = vmatprep.subr.bf16.mxu1 %v5993_v7  ;;  %v6592_v56 = vpack.c.bf16 %v3042_v55, %v3041_v54  ;;  %v3035_v57 = vld [vmem:[%s6825_s8] sm:$0xff] }
 0x5d5   :  { %5262 = vmatprep.mubr.msk.f32.mxu0 %vm138_vm0, %v2695_v58  ;;  %v3036_v58 = vld [vmem:[%s6825_s8 + $0x8] sm:$0xff] }
 0x5dd   :  { %v2670_v59 = vpop.permute.xlu1 %2669 }
 0x5de   :  { %v2690_v13 = vsel %vm1104_vm2, %v2661_v50, %v2670_v59  ;;  %v3040_v50 = vld [vmem:[#allocation11 + $0x8] sm:$0xff]  ;;  %v3037_v59 = vld [vmem:[%s6825_s8 + $0x10] sm:$0xff] }
 0x5df   :  { %v6588_v52 = vpack.c.bf16 %v3040_v50, %v3039_v49 }
 0x5e1   :  { %v2678_v62 = vpop.permute.xlu1 %2677 }
 0x5e2   :  { %v2693_v41 = vsel %vm2691_vm3, %v2690_v13, %v2678_v62  ;;  %v6604_v62 = vpack.c.bf16 %v3036_v58, %v3035_v57  ;;  %v3038_v13 = vld [vmem:[%s6825_s8 + $0x18] sm:$0xff] }
 0x5e5   :  { %v2686_v14 = vpop.permute.xlu1 %2685 }
 0x5e6   :  { %v2696_v0 = vsel %vm2694_vm4, %v2693_v41, %v2686_v14  ;;  %v6611_v41 = vpack.c.bf16 %v3038_v13, %v3037_v59  ;;  %v4960_v14 = vld [vmem:[#allocation10] ss:$0 sm:$0xff] }
 0x5e7   :  { %5263 = vmatmul.mubr.msk.f32.vlgmr.msra.gmra.mrb[14].mxu0 %vm138_vm0, %v2696_v0 }
 0x5e8   :  { %5284 = vmatprep.mubr.msk.f32.mxu0 %vm5988_vm1, %v5986_v19  ;;  %5577 = vmatpush3.bf16.msra.mxu0 %v6550_v6 }
 0x5e9   :  { %5578 = vmatprep.subr.bf16.mxu0 %v5993_v7 }
 0x5ec   :  { %5580 = vmatpush3.bf16.msra.mxu0 %v6556_v11 }
 0x5ed   :  { %5587 = vmatprep.subr.bf16.mxu0 %v5993_v7 }
 0x5ef   :  { %5285 = vmatmul.mubr.f32.vlgmr.msra.gmra.mrb[16].mxu0 %v5986_v19 }
 0x5f0   :  { %5306 = vmatprep.mubr.msk.f32.mxu0 %vm5988_vm1, %v5986_v19  ;;  %5589 = vmatpush3.bf16.msra.mxu0 %v6604_v62 }
 0x5f1   :  { %5590 = vmatprep.subr.bf16.mxu0 %v5993_v7 }
 0x5f4   :  { %5592 = vmatpush3.bf16.msra.mxu0 %v6611_v41 }
 0x5f5   :  { %5599 = vmatprep.subr.bf16.mxu0 %v5993_v7 }
 0x6ba   :  { %v5264_v23 = vpop.f32.mrb[14].mxu0 }
 0x6bb   :  { %v2786_v24 = vadd.f32 %v5264_v23, %v4957_v21  ;;  %v2780_v22 = vpop.f32.mrb[15].mxu0 }
 0x6bc   :  { %v2781_v10 = vadd.f32 %v4957_v21, %v2780_v22 }
 0x6bd   :  { %v2804_v17 = vcombine.high %v2786_v24, %v5986_v19  ;;  %v2811_v16 = vrot.slane %v2786_v24, %v6222_v28 }
 0x6be   :  { %v2789_v18 = vcombine.high %v2781_v10, %v5986_v19  ;;  %v2796_v36 = vrot.slane %v2781_v10, %v6222_v28 }
 0x6bf   :  { %v2818_v29 = vrot.slane %v2804_v17, %v6222_v28 }
 0x6c0   :  { %v2803_v61 = vrot.slane %v2789_v18, %v6222_v28  ;;  %v2819_v30 = vcombine.low %v2796_v36, %v2811_v16  ;;  %v2820_v12 = vcombine.high %v2796_v36, %v2811_v16 }
 0x6c2   :  { %v2827_v31 = vrot.slane %v2819_v30, %v6237_v39  ;;  %v2834_v32 = vrot.slane %v2820_v12, %v6237_v39  ;;  %v2835_v33 = vcombine.low %v2803_v61, %v2818_v29  ;;  %v2836_v34 = vcombine.high %v2803_v61, %v2818_v29  ;;  %v3113_v53 = vpop.f32.mrb[16].mxu0 }
 0x6c3   :  { %v5286_v51 = vpop.f32.mrb[17].mxu0 }
 0x6c4   :  { %v2843_v35 = vrot.slane %v2835_v33, %v6237_v39  ;;  %v2850_v37 = vrot.slane %v2836_v34, %v6237_v39  ;;  %v2851_v38 = vcombine.high %v2827_v31, %v5986_v19  ;;  %v2852_v40 = vcombine.high %v2834_v32, %v5986_v19 }
 0x6c6   :  { %v2853_v42 = vcombine.high %v2843_v35, %v5986_v19  ;;  %v2854_v20 = vcombine.high %v2850_v37, %v5986_v19  ;;  %v2874_v43 = vcombine.low %v2827_v31, %v2851_v38  ;;  %v2875_v44 = vcombine.low %v2834_v32, %v2852_v40 }
 0x6c8   :  { %v2891_v45 = vcombine.low %v2843_v35, %v2853_v42  ;;  %v2892_v46 = vcombine.low %v2850_v37, %v2854_v20  ;;  %v2882_v25 = vrot.slane %v2874_v43, %v6222_v28  ;;  %v2889_v26 = vrot.slane %v2875_v44, %v6222_v28 }
 0x6ca   :  { %v2899_v27 = vrot.slane %v2891_v45, %v6222_v28  ;;  %v2906_v39 = vrot.slane %v2892_v46, %v6222_v28  ;;  %v2890_v47 = vcombine.low %v2882_v25, %v2889_v26 }
 0x6cc   :  { %5273 = vmatprep.mubr.msk.f32.mxu1 %vm138_vm0, %v2890_v47  ;;  %v2907_v48 = vcombine.low %v2899_v27, %v2906_v39 }
 0x6ce   :  { %5274 = vmatmul.mubr.msk.f32.vlgmr.msra.gmra.mrb[20].mxu1 %vm138_vm0, %v2907_v48 }
 0x6cf   :  { %5295 = vmatprep.mubr.msk.f32.mxu1 %vm5988_vm1, %v5986_v19  ;;  %5583 = vmatpush3.bf16.msra.mxu1 %v6588_v52 }
 0x6d0   :  { %5584 = vmatprep.subr.bf16.mxu1 %v5993_v7 }
 0x6d3   :  { %5586 = vmatpush3.bf16.msra.mxu1 %v6592_v56 }
 0x6d4   :  { %5593 = vmatprep.subr.bf16.mxu1 %v5993_v7 }
 0x6d6   :  { %5296 = vmatmul.mubr.f32.vlgmr.msra.gmra.mrb[22].mxu1 %v5986_v19 }
 0x6d7   :  { %5595 = vmatpush3.bf16.msra.mxu1 %v6550_v6  ;;  %5317 = vmatprep.mubr.msk.f32.mxu1 %vm5988_vm1, %v5986_v19 }
 0x6d8   :  { %5596 = vmatprep.subr.bf16.mxu1 %v5993_v7 }
 0x6db   :  { %5598 = vmatpush3.bf16.msra.mxu1 %v6556_v11 }
 0x6dc   :  { %5605 = vmatprep.subr.bf16.mxu1 %v5993_v7 }
 0x7a1   :  { %v5275_v0 = vpop.f32.mrb[20].mxu1 }
 0x7a2   :  { %v6623_v60 = vadd.f32 %v5275_v0, %v4960_v14  ;;  %v2978_v15 = vpop.f32.mrb[21].mxu1 }
 0x7a3   :  { %v2979_v63 = vadd.f32 %v4960_v14, %v2978_v15 }
 0x7a4   :  { %v3013_v58 = vrot.slane %v6623_v60, %v6222_v28 }
 0x7a5   :  { %v2996_v1 = vrot.slane %v2979_v63, %v6222_v28  ;;  %v2989_v32 = vcombine.high %v2979_v63, %v2979_v63 }
 0x7a7   :  { %v3117_v2 = vadd.f32 %v3113_v53, %v2996_v1  ;;  %v3004_v8 = vcombine.high %v2996_v1, %v2996_v1  ;;  %v3003_v34 = vrot.slane %v2989_v32, %v6222_v28 }
 0x7a9   :  { %5778 = vtanh.f32 %v3117_v2  ;;  %v3185_v4 = vpop.f32.mrb[22].mxu1  ;;  %v3005_v25 = vcombine.high %v3003_v34, %v3003_v34 }
 0x7aa   :  { %v5297_v5 = vpop.f32.mrb[23].mxu1 }
 0x7ab   :  { %v3021_v5 = vcombine.high %v3013_v58, %v3013_v58 }
 0x7b3   :  { %v5779_v3 = vpop.eup %5778 }
 0x7b4   :  { %5307 = vmatmul.mubr.msk.f32.vlgmr.msra.gmra.mrb[18].mxu0 %vm138_vm0, %v5779_v3  ;;  %5318 = vmatmul.mubr.msk.f32.vlgmr.msra.gmra.mrb[24].mxu1 %vm138_vm0, %v5779_v3 }
 0x7b5   :  { %5607 = vmatpush3.bf16.msra.mxu1 %v6604_v62  ;;  %5601 = vmatpush3.bf16.msra.mxu0 %v6588_v52 }
 0x7b6   :  { %5608 = vmatprep.subr.bf16.mxu1 %v5993_v7  ;;  %5602 = vmatprep.subr.bf16.mxu0 %v5993_v7 }
 0x7b7   :  { %5339 = vmatprep.mubr.msk.f32.mxu1 %vm5988_vm1, %v5986_v19  ;;  %5328 = vmatprep.mubr.msk.f32.mxu0 %vm5988_vm1, %v5986_v19 }
 0x7b9   :  { %5610 = vmatpush3.bf16.msra.mxu1 %v6611_v41  ;;  %5604 = vmatpush3.bf16.msra.mxu0 %v6592_v56 }
 0x7ba   :  { %5611 = vmatprep.subr.bf16.mxu0 %v5993_v7  ;;  %5617 = vmatprep.subr.bf16.mxu1 %v5993_v7 }
 0x887   :  { %v3258_v21 = vpop.f32.mrb[18].mxu0  ;;  %v3336_v23 = vpop.f32.mrb[24].mxu1 }
 0x888   :  { %v3259_v24 = vadd.f32 %v3258_v21, %v3185_v4  ;;  %v3340_v22 = vadd.f32 %v3336_v23, %v3004_v8  ;;  %v5308_v10 = vpop.f32.mrb[19].mxu0  ;;  %v5319_v17 = vpop.f32.mrb[25].mxu1 }
 0x88a   :  { %v3268_v16 = vadd.f32 %v6643_v9, %v3259_v24  ;;  %5780 = vtanh.f32 %v3340_v22 }
 0x88c   :  { %5782 = vtanh.f32 %v3268_v16 }
 0x894   :  { %v5781_v18 = vpop.eup %5780 }
 0x895   :  { %5340 = vmatmul.mubr.msk.f32.vlgmr.msra.gmra.mrb[26].mxu1 %vm138_vm0, %v5781_v18 }
 0x896   :  { %v5783_v36 = vpop.eup %5782  ;;  %5619 = vmatpush3.bf16.msra.mxu1 %v6588_v52  ;;  %5361 = vmatprep.mubr.msk.f32.mxu1 %vm5988_vm1, %v5986_v19 }
 0x897   :  { %5329 = vmatmul.mubr.msk.f32.vlgmr.msra.gmra.mrb[20].mxu0 %vm138_vm0, %v5783_v36  ;;  %5620 = vmatprep.subr.bf16.mxu1 %v5993_v7 }
 0x898   :  { %5613 = vmatpush3.bf16.msra.mxu0 %v6550_v6  ;;  %5350 = vmatprep.mubr.msk.f32.mxu0 %vm5988_vm1, %v5986_v19 }
 0x899   :  { %5614 = vmatprep.subr.bf16.mxu0 %v5993_v7 }
 0x89a   :  { %5622 = vmatpush3.bf16.msra.mxu1 %v6592_v56 }
 0x89b   :  { %5629 = vmatprep.subr.bf16.mxu1 %v5993_v7 }
 0x89c   :  { %5616 = vmatpush3.bf16.msra.mxu0 %v6556_v11 }
 0x89d   :  { %5623 = vmatprep.subr.bf16.mxu0 %v5993_v7 }
 0x89f   :  { %5351 = vmatmul.mubr.msk.f32.vlgmr.msra.gmra.mrb[22].mxu0 %vm138_vm0, %v5781_v18 }
 0x8a0   :  { %5625 = vmatpush3.bf16.msra.mxu0 %v6604_v62  ;;  %5372 = vmatprep.mubr.msk.f32.mxu0 %vm5988_vm1, %v5986_v19 }
 0x8a1   :  { %5626 = vmatprep.subr.bf16.mxu0 %v5993_v7 }
 0x8a4   :  { %5628 = vmatpush3.bf16.msra.mxu0 %v6611_v41 }
 0x8a5   :  { %5635 = vmatprep.subr.bf16.mxu0 %v5993_v7 }
 0x968   :  { %v3484_v29 = vpop.f32.mrb[26].mxu1 }
 0x969   :  { %v5341_v61 = vpop.f32.mrb[27].mxu1 }
 0x96a   :  { %v3411_v30 = vpop.f32.mrb[20].mxu0  ;;  %v3006_v61 = vcombine.high %v6623_v60, %v6623_v60 }
 0x96b   :  { %v3485_v12 = vadd.f32 %v3484_v29, %v3411_v30  ;;  %v5330_v31 = vpop.f32.mrb[21].mxu0 }
 0x96d   :  { %v3488_v33 = vadd.f32 %v6643_v9, %v3485_v12  ;;  %v3020_v12 = vrot.slane %v3006_v61, %v6222_v28 }
 0x96f   :  { %5784 = vtanh.f32 %v3488_v33 }
 0x972   :  { %v3556_v35 = vpop.f32.mrb[22].mxu0 }
 0x973   :  { %v3560_v37 = vadd.f32 %v3556_v35, %v3003_v34  ;;  %v5352_v38 = vpop.f32.mrb[23].mxu0 }
 0x975   :  { %5786 = vtanh.f32 %v3560_v37  ;;  %v3022_v37 = vcombine.high %v3020_v12, %v3020_v12 }
 0x979   :  { %v5785_v40 = vpop.eup %5784 }
 0x97a   :  { %5362 = vmatmul.mubr.msk.f32.vlgmr.msra.gmra.mrb[28].mxu1 %vm138_vm0, %v5785_v40 }
 0x97b   :  { %5631 = vmatpush3.bf16.msra.mxu1 %v6550_v6  ;;  %5383 = vmatprep.mubr.msk.f32.mxu1 %vm5988_vm1, %v5986_v19 }
 0x97c   :  { %5632 = vmatprep.subr.bf16.mxu1 %v5993_v7 }
 0x97f   :  { %v5787_v42 = vpop.eup %5786  ;;  %5634 = vmatpush3.bf16.msra.mxu1 %v6556_v11 }
 0x980   :  { %5373 = vmatmul.mubr.msk.f32.vlgmr.msra.gmra.mrb[24].mxu0 %vm138_vm0, %v5787_v42  ;;  %5641 = vmatprep.subr.bf16.mxu1 %v5993_v7 }
 0x981   :  { %5637 = vmatpush3.bf16.msra.mxu0 %v6588_v52  ;;  %5394 = vmatprep.mubr.msk.f32.mxu0 %vm5988_vm1, %v5986_v19 }
 0x982   :  { %5384 = vmatmul.mubr.msk.f32.vlgmr.msra.gmra.mrb[30].mxu1 %vm138_vm0, %v5787_v42  ;;  %5638 = vmatprep.subr.bf16.mxu0 %v5993_v7 }
 0x983   :  { %5643 = vmatpush3.bf16.msra.mxu1 %v6604_v62  ;;  %5405 = vmatprep.mubr.msk.f32.mxu1 %vm5988_vm1, %v5986_v19 }
 0x984   :  { %5644 = vmatprep.subr.bf16.mxu1 %v5993_v7 }
 0x985   :  { %5640 = vmatpush3.bf16.msra.mxu0 %v6592_v56 }
 0x986   :  { %5647 = vmatprep.subr.bf16.mxu0 %v5993_v7 }
 0x987   :  { %5646 = vmatpush3.bf16.msra.mxu1 %v6611_v41 }
 0x988   :  { %5653 = vmatprep.subr.bf16.mxu1 %v5993_v7 }
 0xa4d   :  { %v3631_v20 = vpop.f32.mrb[28].mxu1 }
 0xa4e   :  { %v5363_v43 = vpop.f32.mrb[29].mxu1 }
 0xa53   :  { %v3704_v44 = vpop.f32.mrb[24].mxu0 }
 0xa54   :  { %v3705_v45 = vadd.f32 %v3704_v44, %v3631_v20  ;;  %v5374_v46 = vpop.f32.mrb[25].mxu0  ;;  %v4812_v44 = vld [vmem:[%s6828_s11 + $0x10] sm:$0xff] }
 0xa55   :  { %v3776_v26 = vpop.f32.mrb[30].mxu1  ;;  %v4813_v46 = vld [vmem:[%s6828_s11 + $0x18] sm:$0xff] }
 0xa56   :  { %v3708_v27 = vadd.f32 %v6643_v9, %v3705_v45  ;;  %v3780_v39 = vadd.f32 %v3776_v26, %v3005_v25  ;;  %v5385_v47 = vpop.f32.mrb[31].mxu1  ;;  %v5723_v25 = vpack.c.bf16 %v4813_v46, %v4812_v44 }
 0xa58   :  { %5788 = vtanh.f32 %v3708_v27 }
 0xa59   :  { %5790 = vtanh.f32 %v3780_v39 }
 0xa62   :  { %v5789_v48 = vpop.eup %5788 }
 0xa63   :  { %v5791_v49 = vpop.eup %5790  ;;  %5395 = vmatmul.mubr.msk.f32.vlgmr.msra.gmra.mrb[26].mxu0 %vm138_vm0, %v5789_v48 }
 0xa64   :  { %5406 = vmatmul.mubr.msk.f32.vlgmr.msra.gmra.mrb[32].mxu1 %vm138_vm0, %v5791_v49  ;;  %5649 = vmatpush3.bf16.msra.mxu0 %v6550_v6 }
 0xa65   :  { %5650 = vmatprep.subr.bf16.mxu0 %v5993_v7  ;;  %5416 = vmatprep.mubr.msk.f32.mxu0 %vm5988_vm1, %v5986_v19 }
 0xa66   :  { %5655 = vmatpush3.bf16.msra.mxu1 %v6588_v52  ;;  %5427 = vmatprep.mubr.msk.f32.mxu1 %vm5988_vm1, %v5986_v19 }
 0xa67   :  { %5656 = vmatprep.subr.bf16.mxu1 %v5993_v7 }
 0xa68   :  { %5652 = vmatpush3.bf16.msra.mxu0 %v6556_v11 }
 0xa69   :  { %5659 = vmatprep.subr.bf16.mxu0 %v5993_v7 }
 0xa6a   :  { %5658 = vmatpush3.bf16.msra.mxu1 %v6592_v56 }
 0xa6b   :  { %5417 = vmatmul.mubr.msk.f32.vlgmr.msra.gmra.mrb[28].mxu0 %vm138_vm0, %v5791_v49  ;;  %5665 = vmatprep.subr.bf16.mxu1 %v5993_v7 }
 0xa6c   :  { %5661 = vmatpush3.bf16.msra.mxu0 %v6604_v62  ;;  %5438 = vmatprep.mubr.msk.f32.mxu0 %vm5988_vm1, %v5986_v19 }
 0xa6d   :  { %5662 = vmatprep.subr.bf16.mxu0 %v5993_v7 }
 0xa70   :  { %5664 = vmatpush3.bf16.msra.mxu0 %v6611_v41 }
 0xa71   :  { %5671 = vmatprep.subr.bf16.mxu0 %v5993_v7 }
 0xb36   :  { %v3851_v50 = vpop.f32.mrb[26].mxu0 }
 0xb37   :  { %v3924_v53 = vpop.f32.mrb[32].mxu1  ;;  %v5396_v51 = vpop.f32.mrb[27].mxu0 }
 0xb38   :  { %v3925_v54 = vadd.f32 %v3924_v53, %v3851_v50  ;;  %v5407_v55 = vpop.f32.mrb[33].mxu1  ;;  %v4986_v50 = vld [vmem:[%s6829_s12] ss:$0 sm:$0xff] }
 0xb3a   :  { %v3928_v57 = vadd.f32 %v6643_v9, %v3925_v54 }
 0xb3c   :  { %5792 = vtanh.f32 %v3928_v57 }
 0xb3e   :  { %v3996_v59 = vpop.f32.mrb[28].mxu0 }
 0xb3f   :  { %v4000_v13 = vadd.f32 %v3996_v59, %v3013_v58  ;;  %v5418_v14 = vpop.f32.mrb[29].mxu0 }
 0xb41   :  { %5794 = vtanh.f32 %v4000_v13 }
 0xb46   :  { %v5793_v0 = vpop.eup %5792 }
 0xb47   :  { %5428 = vmatmul.mubr.msk.f32.vlgmr.msra.gmra.mrb[34].mxu1 %vm138_vm0, %v5793_v0 }
 0xb48   :  { %5667 = vmatpush3.bf16.msra.mxu1 %v6550_v6  ;;  %5449 = vmatprep.mubr.msk.f32.mxu1 %vm5988_vm1, %v5986_v19 }
 0xb49   :  { %5668 = vmatprep.subr.bf16.mxu1 %v5993_v7 }
 0xb4b   :  { %v5795_v15 = vpop.eup %5794 }
 0xb4c   :  { %5670 = vmatpush3.bf16.msra.mxu1 %v6556_v11  ;;  %5439 = vmatmul.mubr.msk.f32.vlgmr.msra.gmra.mrb[30].mxu0 %vm138_vm0, %v5795_v15 }
 0xb4d   :  { %5673 = vmatpush3.bf16.msra.mxu0 %v6588_v52  ;;  %5677 = vmatprep.subr.bf16.mxu1 %v5993_v7 }
 0xb4e   :  { %5674 = vmatprep.subr.bf16.mxu0 %v5993_v7  ;;  %5460 = vmatprep.mubr.msk.f32.mxu0 %vm5988_vm1, %v5986_v19 }
 0xb4f   :  { %5450 = vmatmul.mubr.msk.f32.vlgmr.msra.gmra.mrb[36].mxu1 %vm138_vm0, %v5795_v15 }
 0xb50   :  { %5679 = vmatpush3.bf16.msra.mxu1 %v6604_v62  ;;  %5471 = vmatprep.mubr.msk.f32.mxu1 %vm5988_vm1, %v5986_v19 }
 0xb51   :  { %5676 = vmatpush3.bf16.msra.mxu0 %v6592_v56  ;;  %5680 = vmatprep.subr.bf16.mxu1 %v5993_v7 }
 0xb52   :  { %5683 = vmatprep.subr.bf16.mxu0 %v5993_v7 }
 0xb54   :  { %5682 = vmatpush3.bf16.msra.mxu1 %v6611_v41 }
 0xb55   :  { %5689 = vmatprep.subr.bf16.mxu1 %v5993_v7 }
 0xc1a   :  { %v4071_v63 = vpop.f32.mrb[34].mxu1 }
 0xc1b   :  { %v5429_v1 = vpop.f32.mrb[35].mxu1 }
 0xc1f   :  { %v4144_v2 = vpop.f32.mrb[30].mxu0 }
 0xc20   :  { %v4145_v3 = vadd.f32 %v4144_v2, %v4071_v63  ;;  %v5440_v4 = vpop.f32.mrb[31].mxu0 }
 0xc22   :  { %v4148_v8 = vadd.f32 %v6643_v9, %v4145_v3  ;;  %v4216_v21 = vpop.f32.mrb[36].mxu1 }
 0xc23   :  { %v4220_v23 = vadd.f32 %v4216_v21, %v3021_v5  ;;  %v5451_v24 = vpop.f32.mrb[37].mxu1 }
 0xc24   :  { %5796 = vtanh.f32 %v4148_v8 }
 0xc25   :  { %5798 = vtanh.f32 %v4220_v23 }
 0xc2e   :  { %v5797_v22 = vpop.eup %5796 }
 0xc2f   :  { %v5799_v10 = vpop.eup %5798  ;;  %5461 = vmatmul.mubr.msk.f32.vlgmr.msra.gmra.mrb[32].mxu0 %vm138_vm0, %v5797_v22 }
 0xc30   :  { %5472 = vmatmul.mubr.msk.f32.vlgmr.msra.gmra.mrb[38].mxu1 %vm138_vm0, %v5799_v10  ;;  %5685 = vmatpush3.bf16.msra.mxu0 %v6550_v6 }
 0xc31   :  { %5686 = vmatprep.subr.bf16.mxu0 %v5993_v7  ;;  %5482 = vmatprep.mubr.msk.f32.mxu0 %vm5988_vm1, %v5986_v19 }
 0xc32   :  { %5691 = vmatpush3.bf16.msra.mxu1 %v6588_v52  ;;  %5493 = vmatprep.mubr.msk.f32.mxu1 %vm5988_vm1, %v5986_v19 }
 0xc33   :  { %5692 = vmatprep.subr.bf16.mxu1 %v5993_v7 }
 0xc34   :  { %5688 = vmatpush3.bf16.msra.mxu0 %v6556_v11 }
 0xc35   :  { %5695 = vmatprep.subr.bf16.mxu0 %v5993_v7 }
 0xc36   :  { %5694 = vmatpush3.bf16.msra.mxu1 %v6592_v56 }
 0xc37   :  { %5483 = vmatmul.mubr.msk.f32.vlgmr.msra.gmra.mrb[34].mxu0 %vm138_vm0, %v5799_v10  ;;  %5701 = vmatprep.subr.bf16.mxu1 %v5993_v7 }
 0xc38   :  { %5697 = vmatpush3.bf16.msra.mxu0 %v6604_v62  ;;  %5504 = vmatprep.mubr.msk.f32.mxu0 %vm5988_vm1, %v5986_v19 }
 0xc39   :  { %5698 = vmatprep.subr.bf16.mxu0 %v5993_v7 }
 0xc3c   :  { %5700 = vmatpush3.bf16.msra.mxu0 %v6611_v41 }
 0xc3d   :  { %5707 = vmatprep.subr.bf16.mxu0 %v5993_v7 }
 0xd02   :  { %v4291_v17 = vpop.f32.mrb[32].mxu0 }
 0xd03   :  { %v4364_v16 = vpop.f32.mrb[38].mxu1  ;;  %v5462_v18 = vpop.f32.mrb[33].mxu0 }
 0xd04   :  { %v4365_v36 = vadd.f32 %v4364_v16, %v4291_v17  ;;  %v5473_v29 = vpop.f32.mrb[39].mxu1 }
 0xd06   :  { %v4368_v30 = vadd.f32 %v6643_v9, %v4365_v36 }
 0xd08   :  { %5800 = vtanh.f32 %v4368_v30 }
 0xd0a   :  { %v4436_v31 = vpop.f32.mrb[34].mxu0 }
 0xd0b   :  { %v4440_v32 = vadd.f32 %v4436_v31, %v3020_v12  ;;  %v5484_v33 = vpop.f32.mrb[35].mxu0 }
 0xd0d   :  { %5802 = vtanh.f32 %v4440_v32 }
 0xd12   :  { %v5801_v34 = vpop.eup %5800 }
 0xd13   :  { %5494 = vmatmul.mubr.msk.f32.vlgmr.msra.gmra.mrb[40].mxu1 %vm138_vm0, %v5801_v34 }
 0xd14   :  { %5703 = vmatpush3.bf16.msra.mxu1 %v6550_v6  ;;  %5515 = vmatprep.mubr.msk.f32.mxu1 %vm5988_vm1, %v5986_v19 }
 0xd15   :  { %5704 = vmatprep.subr.bf16.mxu1 %v5993_v7 }
 0xd17   :  { %v5803_v60 = vpop.eup %5802 }
 0xd18   :  { %5706 = vmatpush3.bf16.msra.mxu1 %v6556_v11  ;;  %5505 = vmatmul.mubr.msk.f32.vlgmr.msra.gmra.mrb[36].mxu0 %vm138_vm0, %v5803_v60 }
 0xd19   :  { %5713 = vmatprep.subr.bf16.mxu1 %v5993_v7  ;;  %5709 = vmatpush3.bf16.msra.mxu0 %v6588_v52 }
 0xd1a   :  { %5710 = vmatprep.subr.bf16.mxu0 %v5993_v7  ;;  %5526 = vmatprep.mubr.msk.f32.mxu0 %vm5988_vm1, %v5986_v19 }
 0xd1b   :  { %5516 = vmatmul.mubr.msk.f32.vlgmr.msra.gmra.mrb[42].mxu1 %vm138_vm0, %v5803_v60 }
 0xd1c   :  { %5715 = vmatpush3.bf16.msra.mxu1 %v6604_v62  ;;  %5537 = vmatprep.mubr.msk.f32.mxu1 %vm5988_vm1, %v5986_v19 }
 0xd1d   :  { %5716 = vmatprep.subr.bf16.mxu1 %v5993_v7  ;;  %5712 = vmatpush3.bf16.msra.mxu0 %v6592_v56  ;;  %v4810_v56 = vld [vmem:[%s6828_s11] sm:$0xff] }
 0xd1e   :  { %5719 = vmatprep.subr.bf16.mxu0 %v5993_v7 }
 0xd20   :  { %5718 = vmatpush3.bf16.msra.mxu1 %v6611_v41  ;;  %v4811_v41 = vld [vmem:[%s6828_s11 + $0x8] sm:$0xff]  ;;  %s5994_s11 = smov [#allocation13]  }
 0xd21   :  { %v5720_v45 = vpack.c.bf16 %v4811_v41, %v4810_v56  ;;  %s4902_s1 = sshll.u32 %s5994_s11, 4  ;;  %s4903_s1 = int_to_ptr.vmem [resolvable:$true] %s4902_s1 }
 0xd22   :  { %s5942_s23 = scalar_lea.vmem %s4903_s1, 32  ;;  %p5947_p7 = scmp.lt.s32.totalorder %s4903_s1, %s4903_s1 }
 0xd23   :  { %p5943_p6 = scmp.ne.s32.totalorder %s4903_s1, %s5942_s23  ;;  %p5948_p8 = scmp.lt.s32.totalorder %s5942_s23, %s5942_s23 }
 0xd25   :  { %p5949_p9 = por %p5948_p8, %p5947_p7 }
 0xd27   :  { %p5950_p10 = pnand %p5949_p9, %p5943_p6 }
 0xde6   :  { %v4511_v28 = vpop.f32.mrb[40].mxu1 }
 0xde7   :  { %v5495_v6 = vpop.f32.mrb[41].mxu1 }
 0xdeb   :  { %v4584_v11 = vpop.f32.mrb[36].mxu0 }
 0xdec   :  { %v4585_v52 = vadd.f32 %v4584_v11, %v4511_v28  ;;  %v5506_v35 = vpop.f32.mrb[37].mxu0 }
 0xdee   :  { %v4588_v38 = vadd.f32 %v6643_v9, %v4585_v52  ;;  %v4656_v62 = vpop.f32.mrb[42].mxu1 }
 0xdef   :  { %v4660_v40 = vadd.f32 %v4656_v62, %v3022_v37  ;;  %v5517_v42 = vpop.f32.mrb[43].mxu1 }
 0xdf0   :  { %5804 = vtanh.f32 %v4588_v38 }
 0xdf1   :  { %5806 = vtanh.f32 %v4660_v40 }
 0xdfa   :  { %v5805_v20 = vpop.eup %5804 }
 0xdfb   :  { %v5807_v43 = vpop.eup %5806  ;;  %5527 = vmatmul.mubr.msk.f32.vlgmr.msra.gmra.mrb[38].mxu0 %vm138_vm0, %v5805_v20 }
 0xdfc   :  { %5538 = vmatmul.mubr.msk.f32.vlgmr.msra.gmra.mrb[44].mxu1 %vm138_vm0, %v5807_v43  ;;  %5548 = vmatprep.mubr.msk.f32.mxu0 %vm5988_vm1, %v5986_v19 }
 0xdfd   :  { %5721 = vmatpush3.bf16.msra.mxu0 %v5720_v45 }
 0xdfe   :  { %5722 = vmatprep.subr.bf16.mxu0 %v5993_v7 }
 0xe01   :  { %5724 = vmatpush3.bf16.msra.mxu0 %v5723_v25 }
 0xece   :  { %v4731_v19 = vpop.f32.mrb[38].mxu0 }
 0xecf   :  { %v4804_v26 = vpop.f32.mrb[44].mxu1  ;;  %v5528_v27 = vpop.f32.mrb[39].mxu0 }
 0xed0   :  { %v4805_v39 = vadd.f32 %v4804_v26, %v4731_v19  ;;  %v5539_v47 = vpop.f32.mrb[45].mxu1 }
 0xed2   :  { %v4808_v48 = vadd.f32 %v6643_v9, %v4805_v39 }
 0xed4   :  { %5808 = vtanh.f32 %v4808_v48 }
 0xede   :  { %v5809_v49 = vpop.eup %5808 }
 0xedf   :  { %5549 = vmatmul.mubr.msk.f32.vlgmr.msra.gmra.mrb[40].mxu0 %vm138_vm0, %v5809_v49 }
 0xfb2   :  { %v4890_v53 = vpop.f32.mrb[40].mxu0 }
 0xfb3   :  { %v4891_v7 = vadd.f32 %v4986_v50, %v4890_v53  ;;  %v5550_v51 = vpop.f32.mrb[41].mxu0 }
 0xfb5   :  { %4895 = vst.msk [vmem:[#allocation13] sm:$0x3] %vm4894_vm5, %v4891_v7 }
 0xfb6   :  { %5953 = shalt.err (!%p5950_p10)
}
 0xfb7   :  { %s5954_s25 = scalar_lea.hbm %s6830_s13, 32 }
 0xfb8   :  { %p5955_p11 = scmp.ne.s32.totalorder %s6830_s13, %s5954_s25  ;;  %p5958_p12 = scmp.lt.u32.totalorder %s5954_s25, %s6830_s13 }
 0xfba   :  { %p5960_p13 = pnand %p5958_p12, %p5955_p11 }
 0xfbc   :  { %5963 = shalt.err (!%p5960_p13)
}
 0xfbd   :  { %4905 = dma.vmem_to_hbm [thread:$0]  %s4903_s1, 32, %s6830_s13, [#allocation4]  }
 0xfbe   :  { %5972 = dma.done.wait [#allocation4], 32  }
 0xfbf   :  { %5973 = vsyncadd [#allocation4], 4294967264 }
 0xfc0   :  { %4909 = vsyncpa [#allocation3], 1 }
 0xfc1   :  { %4910 = vsyncpa [#allocation6], 1 }
 0xfc2   :  { %4911 = vsyncpa [#allocation9], 1 }
 0xfc3   :  { %4912 = vsyncpa [#allocation12], 1 }
 0xfc4   :  { %4913 = vsyncpa [#allocation4], 1 }

</bundles_post_ra>
